<compile_context>
chip_gen: v7x
topology: tpu7x:2x2x1
jax: 0.10.0
libtpu: 0.0.40
codegen_flags: <defaults>
</compile_context>

<pallas_src>
import functools
from math import ceil

import jax
import jax.numpy as jnp
from jax import lax
from jax.experimental import pallas as pl
from jax.experimental.pallas import tpu as pltpu

EPS = 1e-15
NUM_SAGE_LAYERS = 3

# TODO(synk): BatchNorm runs in eval mode (running stats mean=0, var=1, affine
# identity -> a constant scale); train-mode cross-batch statistics would couple
# the per-graph "parallel" grid programs.
_BN_EVAL_SCALE = float(1.0 / (1.0 + 1e-5) ** 0.5)


def _compiler_params():
    return pltpu.CompilerParams(
        dimension_semantics=("parallel",),
        vmem_limit_bytes=48 * 1024 * 1024,
    )


# --------------------------------------------------------------------------
# BlockSpec helpers
# --------------------------------------------------------------------------
def _full_spec(shape):
    """Whole-array, grid-invariant block (weights / biases)."""
    nd = len(shape)
    return pl.BlockSpec(tuple(shape), lambda b, nd=nd: (0,) * nd)


def _batch_spec(shape):
    """Block the leading batch dim with size 1; last two dims stay full."""
    nd = len(shape)
    blk = (1,) + tuple(shape[1:])
    return pl.BlockSpec(blk, lambda b, nd=nd: (b,) + (0,) * (nd - 1))


# --------------------------------------------------------------------------
# In-kernel helpers
# --------------------------------------------------------------------------
def _l2norm(t):
    n2 = jnp.sum(t * t, axis=-1, keepdims=True)
    return t * lax.rsqrt(jnp.maximum(n2, 1e-24))   # == t / max(||t||_2, 1e-12)


def _sum_all(t):
    return jnp.sum(jnp.sum(t, axis=1, keepdims=True), axis=0, keepdims=True)


# --------------------------------------------------------------------------
# Kernel 1: fused DiffPool layer (per-graph grid program)
#   gnn_pool (3xSAGE + lin) + gnn_embed (3xSAGE) with shared aggregations,
#   dense_diff_pool (softmax / s^T x / s^T A s / link / entropy partials),
#   min-max + hard-Gumbel thresholding, diag=1, per-layer node-max readout.
# --------------------------------------------------------------------------
def diffpool_layer_kernel(x_ref, adj_ref, mask_ref, g0_ref, g1_ref,
                          wr1, wo1, b1, wr2, wo2, b2, wr3, wo3, b3, wl, bl,
                          ox_ref, oadj_ref, omax_ref, loss_ref,
                          *, apply_mask, hidden, k_clusters):
    H, K = hidden, k_clusters
    x = x_ref[0]                          # (N, C)
    adj = adj_ref[0]                      # (N, N)
    mask = mask_ref[0] if apply_mask else None

    deg = jnp.maximum(jnp.sum(adj, axis=-1, keepdims=True), 1.0)
    inv_deg = 1.0 / deg                   # exact division (review concern)
    adj_bf = adj.astype(jnp.bfloat16)     # adjacency is exactly {0,1}

    def mean_agg(h):
        # dominant (N,N) @ (N,C) work on the bf16 MXU path, f32 accumulation
        return jnp.dot(adj_bf, h.astype(jnp.bfloat16),
                       preferred_element_type=jnp.float32) * inv_deg

    def sage_pair(agg, h, wr, wo, b, split):
        # Fused pool|embed DenseSAGEConv: rel/root as two matmuls sharing an
        # accumulator (no lane-misaligned [agg, h] concat); pool & embed
        # branches concatenated along the output channels.
        out = (jnp.dot(agg, wr[...], preferred_element_type=jnp.float32)
               + jnp.dot(h, wo[...], preferred_element_type=jnp.float32) + b[...])
        pa = _l2norm(out[:, :split])
        pb = _l2norm(out[:, split:])
        if mask is not None:
            pa = pa * mask
            pb = pb * mask
        return pa, pb

    # SAGE layer 1 (shared aggregation of x feeds both branches)
    p1, e1 = sage_pair(mean_agg(x), x, wr1, wo1, b1, H)
    p1 = jnp.maximum(p1, 0.0) * _BN_EVAL_SCALE
    e1 = jnp.maximum(e1, 0.0) * _BN_EVAL_SCALE

    # SAGE layer 2: single adj @ [p1 | e1] aggregation, block-diag fused weights
    h12 = jnp.concatenate([p1, e1], axis=-1)
    p2, e2 = sage_pair(mean_agg(h12), h12, wr2, wo2, b2, H)
    p2 = jnp.maximum(p2, 0.0) * _BN_EVAL_SCALE
    e2 = jnp.maximum(e2, 0.0) * _BN_EVAL_SCALE

    # SAGE layer 3 (no relu / bn)
    h23 = jnp.concatenate([p2, e2], axis=-1)
    p3, e3 = sage_pair(mean_agg(h23), h23, wr3, wo3, b3, K)

    # gnn_pool lin: ONE matmul over the channel-concatenated [p1|p2|p3]
    s_logits = jnp.dot(jnp.concatenate([p1, p2, p3], axis=-1), wl[...],
                       preferred_element_type=jnp.float32) + bl[...]

    # ---- dense_diff_pool ----
    smax = jnp.max(s_logits, axis=-1, keepdims=True)
    se = jnp.exp(s_logits - smax)
    s = se / jnp.sum(se, axis=-1, keepdims=True)     # exact softmax denominator
    if mask is not None:
        s = s * mask                                 # e1/e2/e3 already masked

    e_cat = jnp.concatenate([e1, e2, e3], axis=-1)   # (N, emb), emb lane-dense
    xp = jnp.einsum('nk,nc->kc', s, e_cat, preferred_element_type=jnp.float32)
    ox_ref[0] = xp                                   # (K, emb)
    omax_ref[0] = jnp.max(xp, axis=0, keepdims=True)  # per-layer readout feature

    sa = jnp.einsum('nk,nm->km', s, adj, preferred_element_type=jnp.float32)
    oadj = jnp.dot(sa, s, preferred_element_type=jnp.float32)   # (K, K)

    rowk = lax.broadcasted_iota(jnp.int32, (K, K), 0)
    colk = lax.broadcasted_iota(jnp.int32, (K, K), 1)
    diagk = (rowk == colk).astype(jnp.float32)

    # link loss without materialising the (N, N) residual (per-graph partial):
    #   ||A - S S^T||_F^2 = sum(A*A) - 2 tr(S^T A S) + ||S^T S||_F^2
    a2 = _sum_all(adj * adj)
    tr = _sum_all(oadj * diagk)
    sts = jnp.einsum('nk,nl->kl', s, s, preferred_element_type=jnp.float32)
    s2 = _sum_all(sts * sts)
    link_sq = jnp.maximum(a2 - 2.0 * tr + s2, 0.0)
    ent = _sum_all(-s * jnp.log(s + EPS))
    loss_ref[0] = jnp.concatenate([link_sq, ent], axis=-1)      # (1, 2)

    # coarsened-adj post-processing: per-graph min-max norm, hard Gumbel keep,
    # symmetric (noise pre-mirrored in the wrapper), diag = 1
    amin = jnp.min(jnp.min(oadj, axis=1, keepdims=True), axis=0, keepdims=True)
    amax = jnp.max(jnp.max(oadj, axis=1, keepdims=True), axis=0, keepdims=True)
    a_n = (oadj - amin) / jnp.maximum(amax - amin, 1e-12)       # exact division
    keep = ((a_n + g0_ref[0]) > ((1.0 - a_n) + g1_ref[0])).astype(jnp.float32)
    oadj_ref[0] = jnp.where(diagk > 0.0, 1.0, keep)


def fused_diffpool_layer(x, adj, mask, g0, g1, lp, apply_mask):
    B, N, _ = x.shape
    K = lp['k']
    emb = lp['emb']
    inputs = [x, adj, mask, g0, g1,
              lp['wr1'], lp['wo1'], lp['b1'],
              lp['wr2'], lp['wo2'], lp['b2'],
              lp['wr3'], lp['wo3'], lp['b3'],
              lp['wl'], lp['bl']]
    in_specs = ([_batch_spec(a.shape) for a in inputs[:5]]
                + [_full_spec(a.shape) for a in inputs[5:]])
    out_shape = (jax.ShapeDtypeStruct((B, K, emb), jnp.float32),   # pooled x
                 jax.ShapeDtypeStruct((B, K, K), jnp.float32),     # hardened adj
                 jax.ShapeDtypeStruct((B, 1, emb), jnp.float32),   # node-max readout
                 jax.ShapeDtypeStruct((B, 1, 2), jnp.float32))     # [link_sq, ent_sum]
    out_specs = (_batch_spec((B, K, emb)), _batch_spec((B, K, K)),
                 _batch_spec((B, 1, emb)), _batch_spec((B, 1, 2)))
    return pl.pallas_call(
        functools.partial(diffpool_layer_kernel, apply_mask=apply_mask,
                          hidden=lp['hidden'], k_clusters=K),
        out_shape=out_shape,
        grid=(B,),
        in_specs=in_specs,
        out_specs=out_specs,
        compiler_params=_compiler_params(),
    )(*inputs)


# --------------------------------------------------------------------------
# Kernel 2: final_embed SAGE block + node-max + fused 2-layer MLP head
# --------------------------------------------------------------------------
def final_readout_kernel(*refs, n_prev):
    x_ref, adj_ref = refs[0], refs[1]
    (w1r, w1o, b1, w2r, w2o, b2, w3r, w3o, b3) = refs[2:11]
    prev_max = refs[11:11 + n_prev]
    lin1, bl1, lin2, bl2, out_ref = refs[11 + n_prev:]

    x = x_ref[0]            # (K, emb)
    adj = adj_ref[0]        # (K, K), hard 0/1 with unit diagonal
    deg = jnp.maximum(jnp.sum(adj, axis=-1, keepdims=True), 1.0)
    inv_deg = 1.0 / deg

    def sage(h, wr, wo, b):
        agg = jnp.dot(adj, h, preferred_element_type=jnp.float32) * inv_deg
        out = (jnp.dot(agg, wr[...], preferred_element_type=jnp.float32)
               + jnp.dot(h, wo[...], preferred_element_type=jnp.float32) + b[...])
        return _l2norm(out)

    # final_embed: SAGEConvolutions(lin=False), no mask
    e1 = jnp.maximum(sage(x, w1r, w1o, b1), 0.0) * _BN_EVAL_SCALE
    e2 = jnp.maximum(sage(e1, w2r, w2o, b2), 0.0) * _BN_EVAL_SCALE
    e3 = sage(e2, w3r, w3o, b3)

    # fused readout head: one (1, emb*(L+1)) row -> one lin1 matmul -> lin2
    row = jnp.concatenate(
        [pm[0] for pm in prev_max]
        + [jnp.max(e1, axis=0, keepdims=True),
           jnp.max(e2, axis=0, keepdims=True),
           jnp.max(e3, axis=0, keepdims=True)], axis=-1)
    h = jnp.maximum(jnp.dot(row, lin1[...], preferred_element_type=jnp.float32)
                    + bl1[...], 0.0)
    out_ref[0] = jnp.dot(h, lin2[...], preferred_element_type=jnp.float32) + bl2[...]


def final_embed_readout(x, adj, fp, x_max_list, head):
    B = x.shape[0]
    ncls = head['lin2'].shape[1]
    weights1 = [fp['wr1'], fp['wo1'], fp['b1'],
                fp['wr2'], fp['wo2'], fp['b2'],
                fp['wr3'], fp['wo3'], fp['b3']]
    weights2 = [head['lin1'], head['b1'], head['lin2'], head['b2']]
    inputs = [x, adj] + weights1 + list(x_max_list) + weights2
    in_specs = ([_batch_spec(x.shape), _batch_spec(adj.shape)]
                + [_full_spec(w.shape) for w in weights1]
                + [_batch_spec(m.shape) for m in x_max_list]
                + [_full_spec(w.shape) for w in weights2])
    out = pl.pallas_call(
        functools.partial(final_readout_kernel, n_prev=len(x_max_list)),
        out_shape=jax.ShapeDtypeStruct((B, 1, ncls), jnp.float32),
        grid=(B,),
        in_specs=in_specs,
        out_specs=_batch_spec((B, 1, ncls)),
        compiler_params=_compiler_params(),
    )(*inputs)
    return out[:, 0, :]


# --------------------------------------------------------------------------
# Parameter construction (deterministic, synthetic; fused / padded layouts)
# --------------------------------------------------------------------------
def _w(key, c_in, c_out, scale=0.1):
    return jax.random.normal(key, (c_in, c_out), jnp.float32) * scale


def _w_outpad(key, c_in, c_out, c_out_pad, scale=0.1):
    w = _w(key, c_in, c_out, scale)
    if c_out_pad > c_out:
        w = jnp.concatenate(
            [w, jnp.zeros((c_in, c_out_pad - c_out), jnp.float32)], axis=1)
    return w


def _block_diag(a, b):
    top = jnp.concatenate([a, jnp.zeros((a.shape[0], b.shape[1]), a.dtype)], axis=1)
    bot = jnp.concatenate([jnp.zeros((b.shape[0], a.shape[1]), b.dtype), b], axis=1)
    return jnp.concatenate([top, bot], axis=0)


def _round_up(v, m):
    return ((v + m - 1) // m) * m


def init_diffpool_layer_params(key, c_in, hidden, k_clusters, embed_dim, embed_pad):
    H, K = hidden, k_clusters
    ks = jax.random.split(key, 15)
    p = dict(hidden=H, k=K, emb=2 * H + embed_pad)
    # SAGE layer 1: pool & embed branches fused along the output channels.
    p['wr1'] = jnp.concatenate([_w(ks[0], c_in, H), _w(ks[1], c_in, H)], axis=1)
    p['wo1'] = jnp.concatenate([_w(ks[2], c_in, H), _w(ks[3], c_in, H)], axis=1)
    p['b1'] = jnp.zeros((1, 2 * H), jnp.float32)
    # SAGE layer 2: block-diagonal over the [pool | embed] channel split.
    p['wr2'] = _block_diag(_w(ks[4], H, H), _w(ks[5], H, H))
    p['wo2'] = _block_diag(_w(ks[6], H, H), _w(ks[7], H, H))
    p['b2'] = jnp.zeros((1, 2 * H), jnp.float32)
    # SAGE layer 3: pool -> K cluster logits, embed -> embed_dim (zero-padded to
    # embed_pad so the concatenated embed output is 128-lane aligned; padded
    # channels stay exactly zero through L2-norm / pooling / readout).
    p['wr3'] = _block_diag(_w(ks[8], H, K),
                           _w_outpad(ks[9], H, embed_dim, embed_pad))
    p['wo3'] = _block_diag(_w(ks[10], H, K),
                           _w_outpad(ks[11], H, embed_dim, embed_pad))
    p['b3'] = jnp.zeros((1, K + embed_pad), jnp.float32)
    # gnn_pool final Linear((2H + K) -> K): contraction-stacked -> one matmul.
    p['wl'] = jnp.concatenate([_w(ks[12], H, K), _w(ks[13], H, K),
                               _w(ks[14], K, K)], axis=0)
    p['bl'] = jnp.zeros((1, K), jnp.float32)
    return p


def init_final_embed_params(key, c_in, hidden, out_dim, out_pad):
    ks = jax.random.split(key, 6)
    return dict(
        wr1=_w(ks[0], c_in, hidden), wo1=_w(ks[1], c_in, hidden),
        b1=jnp.zeros((1, hidden), jnp.float32),
        wr2=_w(ks[2], hidden, hidden), wo2=_w(ks[3], hidden, hidden),
        b2=jnp.zeros((1, hidden), jnp.float32),
        wr3=_w_outpad(ks[4], hidden, out_dim, out_pad),
        wo3=_w_outpad(ks[5], hidden, out_dim, out_pad),
        b3=jnp.zeros((1, out_pad), jnp.float32))


def init_diffpool_params(key, num_features, num_classes, max_num_nodes,
                         num_layers, hidden, out_dim, mlp_hidden):
    coarse = 0.1 if num_layers == 1 else 0.25
    no_new = ceil(coarse * max_num_nodes)
    emb_real = (NUM_SAGE_LAYERS - 1) * hidden + out_dim
    emb_pad = _round_up(emb_real, 128)                  # lane-dense pooled feats
    out_pad = emb_pad - (NUM_SAGE_LAYERS - 1) * hidden  # padded conv3 width
    keys = jax.random.split(key, num_layers + 3)
    layers = []
    dim_in = num_features
    for i in range(num_layers):
        layers.append(init_diffpool_layer_params(
            keys[i], dim_in, hidden, no_new, out_dim, out_pad))
        dim_in = emb_pad
        no_new = ceil(no_new * coarse)
    final_embed = init_final_embed_params(keys[num_layers], emb_pad, hidden,
                                          out_dim, out_pad)
    head = dict(
        lin1=_w(keys[num_layers + 1], emb_pad * (num_layers + 1), mlp_hidden),
        b1=jnp.zeros((1, mlp_hidden), jnp.float32),
        lin2=_w(keys[num_layers + 2], mlp_hidden, num_classes),
        b2=jnp.zeros((1, num_classes), jnp.float32))
    return dict(diffpool_layers=layers, final_embed=final_embed, head=head)


# --------------------------------------------------------------------------
# Model forward (DiffPoolLayer + DiffPool)
# --------------------------------------------------------------------------
def diffpool_forward(x, adj, mask, params, key):
    B = x.shape[0]
    x_max_all = []
    l_total = jnp.float32(0.0)
    e_total = jnp.float32(0.0)
    ph_loss = jnp.float32(0.0)
    for i, lp in enumerate(params['diffpool_layers']):
        apply_mask = (i == 0)
        N = x.shape[1]
        m = mask if apply_mask else jnp.ones((B, N, 1), jnp.float32)
        key, sub = jax.random.split(key)
        K = lp['k']
        g = jax.random.gumbel(sub, (2, B, K, K), dtype=jnp.float32)
        # Mirror the Gumbel noise across the diagonal so the in-kernel hard
        # threshold is already symmetric: equivalent to torch.triu(hard) +
        # triu(hard).T because the coarsened adjacency s^T A s is symmetric.
        g = jnp.triu(g) + jnp.swapaxes(jnp.triu(g, 1), -1, -2)
        x, adj, x_max, losses = fused_diffpool_layer(x, adj, m, g[0], g[1], lp,
                                                     apply_mask)
        x_max_all.append(x_max)
        # dense_diff_pool reductions: Frobenius norm over the whole batch / numel,
        # entropy mean over B*N rows (per-graph partial sums come from the kernel).
        l_total = l_total + jnp.sqrt(
            jnp.maximum(jnp.sum(losses[:, 0, 0]), 0.0)) / float(B * N * N)
        e_total = e_total + jnp.sum(losses[:, 0, 1]) / float(B * N)
        # TODO(synk): TopologyLayer (persistent-homology filtration), ph_loss and
        # the persistence-reweighted adjacency rebuild have no definition in the
        # spec; the Gumbel-hardened adjacency is carried forward instead.
    logits = final_embed_readout(x, adj, params['final_embed'], x_max_all,
                                 params['head'])
    return logits, l_total, e_total, ph_loss, []


# --------------------------------------------------------------------------
# Main
# --------------------------------------------------------------------------
if __name__ == "__main__":
    key = jax.random.PRNGKey(0)
    B, N, F_IN = 2, 16, 8
    HIDDEN, OUT_DIM, MLP_HIDDEN, NUM_CLASSES, NUM_LAYERS = 32, 32, 32, 4, 1

    k_x, k_adj, k_p, k_g = jax.random.split(key, 4)

    # dense-batched node features, symmetric binary adjacency, valid-node mask
    x = jax.random.normal(k_x, (B, N, F_IN), jnp.float32)
    a = (jax.random.uniform(k_adj, (B, N, N)) < 0.3).astype(jnp.float32)
    adj = jnp.triu(a, 1)
    adj = adj + jnp.swapaxes(adj, 1, 2)
    valid = jnp.array([16, 12])
    mask = (jnp.arange(N)[None, :] < valid[:, None]).astype(jnp.float32)[..., None]
    x = x * mask
    adj = adj * mask * jnp.swapaxes(mask, 1, 2)

    params = init_diffpool_params(k_p, F_IN, NUM_CLASSES, N, NUM_LAYERS,
                                  HIDDEN, OUT_DIM, MLP_HIDDEN)

    logits, l_tot, e_tot, ph_loss, _vis = diffpool_forward(x, adj, mask, params, k_g)
    jax.block_until_ready(logits)

    assert logits.shape == (B, NUM_CLASSES)
    assert bool(jnp.all(jnp.isfinite(logits)))
    assert bool(jnp.isfinite(l_tot)) and bool(jnp.isfinite(e_tot))
    print("KERNEL_OK")
</pallas_src>

<mosaic_0001>
module attributes {stable_mosaic.version = 11 : i64} {
  func.func @diffpool_layer_kernel(%arg0: i32, %arg1: memref<1x16x8xf32, #tpu.memory_space<vmem>>, %arg2: memref<1x16x16xf32, #tpu.memory_space<vmem>>, %arg3: memref<1x16x1xf32, #tpu.memory_space<vmem>>, %arg4: memref<1x2x2xf32, #tpu.memory_space<vmem>>, %arg5: memref<1x2x2xf32, #tpu.memory_space<vmem>>, %arg6: memref<8x64xf32, #tpu.memory_space<vmem>>, %arg7: memref<8x64xf32, #tpu.memory_space<vmem>>, %arg8: memref<1x64xf32, #tpu.memory_space<vmem>>, %arg9: memref<64x64xf32, #tpu.memory_space<vmem>>, %arg10: memref<64x64xf32, #tpu.memory_space<vmem>>, %arg11: memref<1x64xf32, #tpu.memory_space<vmem>>, %arg12: memref<64x66xf32, #tpu.memory_space<vmem>>, %arg13: memref<64x66xf32, #tpu.memory_space<vmem>>, %arg14: memref<1x66xf32, #tpu.memory_space<vmem>>, %arg15: memref<66x2xf32, #tpu.memory_space<vmem>>, %arg16: memref<1x2xf32, #tpu.memory_space<vmem>>, %arg17: memref<1x2x128xf32, #tpu.memory_space<vmem>>, %arg18: memref<1x2x2xf32, #tpu.memory_space<vmem>>, %arg19: memref<1x1x128xf32, #tpu.memory_space<vmem>>, %arg20: memref<1x1x2xf32, #tpu.memory_space<vmem>>) attributes {dimension_semantics = [#tpu.dimension_semantics<parallel>], iteration_bounds = array<i64: 2>, scalar_prefetch = 0 : i64, scratch_operands = 0 : i64, tpu.core_type = #tpu.core_type<tc>, window_params = [{transform_indices = @transform_0, window_bounds = array<i64: 1, 16, 8>}, {transform_indices = @transform_1, window_bounds = array<i64: 1, 16, 16>}, {transform_indices = @transform_2, window_bounds = array<i64: 1, 16, 1>}, {transform_indices = @transform_3, window_bounds = array<i64: 1, 2, 2>}, {transform_indices = @transform_4, window_bounds = array<i64: 1, 2, 2>}, {pipeline_mode = #tpu.pipeline_mode<synchronous>, transform_indices = @transform_5, window_bounds = array<i64: 8, 64>}, {pipeline_mode = #tpu.pipeline_mode<synchronous>, transform_indices = @transform_6, window_bounds = array<i64: 8, 64>}, {pipeline_mode = #tpu.pipeline_mode<synchronous>, transform_indices = @transform_7, window_bounds = array<i64: 1, 64>}, {pipeline_mode = #tpu.pipeline_mode<synchronous>, transform_indices = @transform_8, window_bounds = array<i64: 64, 64>}, {pipeline_mode = #tpu.pipeline_mode<synchronous>, transform_indices = @transform_9, window_bounds = array<i64: 64, 64>}, {pipeline_mode = #tpu.pipeline_mode<synchronous>, transform_indices = @transform_10, window_bounds = array<i64: 1, 64>}, {pipeline_mode = #tpu.pipeline_mode<synchronous>, transform_indices = @transform_11, window_bounds = array<i64: 64, 66>}, {pipeline_mode = #tpu.pipeline_mode<synchronous>, transform_indices = @transform_12, window_bounds = array<i64: 64, 66>}, {pipeline_mode = #tpu.pipeline_mode<synchronous>, transform_indices = @transform_13, window_bounds = array<i64: 1, 66>}, {pipeline_mode = #tpu.pipeline_mode<synchronous>, transform_indices = @transform_14, window_bounds = array<i64: 66, 2>}, {pipeline_mode = #tpu.pipeline_mode<synchronous>, transform_indices = @transform_15, window_bounds = array<i64: 1, 2>}, {transform_indices = @transform_16, window_bounds = array<i64: 1, 2, 128>}, {transform_indices = @transform_17, window_bounds = array<i64: 1, 2, 2>}, {transform_indices = @transform_18, window_bounds = array<i64: 1, 1, 128>}, {transform_indices = @transform_19, window_bounds = array<i64: 1, 1, 2>}]} {
    %c0 = arith.constant 0 : index
    %c0_0 = arith.constant 0 : index
    %c0_1 = arith.constant 0 : index
    %0 = vector.load %arg1[%c0, %c0_0, %c0_1] : memref<1x16x8xf32, #tpu.memory_space<vmem>>, vector<1x16x8xf32>
    %1 = vector.shape_cast %0 : vector<1x16x8xf32> to vector<16x8xf32>
    %c0_2 = arith.constant 0 : index
    %c0_3 = arith.constant 0 : index
    %c0_4 = arith.constant 0 : index
    %2 = vector.load %arg2[%c0_2, %c0_3, %c0_4] : memref<1x16x16xf32, #tpu.memory_space<vmem>>, vector<1x16x16xf32>
    %3 = vector.shape_cast %2 : vector<1x16x16xf32> to vector<16x16xf32>
    %c0_5 = arith.constant 0 : index
    %c0_6 = arith.constant 0 : index
    %c0_7 = arith.constant 0 : index
    %4 = vector.load %arg3[%c0_5, %c0_6, %c0_7] : memref<1x16x1xf32, #tpu.memory_space<vmem>>, vector<1x16x1xf32>
    %5 = vector.shape_cast %4 : vector<1x16x1xf32> to vector<16x1xf32>
    %cst = arith.constant dense<0.000000e+00> : vector<16xf32>
    %6 = vector.multi_reduction <add>, %3, %cst [1] : vector<16x16xf32> to vector<16xf32>
    %7 = vector.shape_cast %6 : vector<16xf32> to vector<16x1xf32>
    %cst_8 = arith.constant 1.000000e+00 : f32
    %8 = vector.broadcast %cst_8 : f32 to vector<16x1xf32>
    %9 = arith.maximumf %7, %8 : vector<16x1xf32>
    %cst_9 = arith.constant 1.000000e+00 : f32
    %10 = vector.broadcast %cst_9 : f32 to vector<16x1xf32>
    %11 = arith.divf %10, %9 : vector<16x1xf32>
    %12 = arith.truncf %3 : vector<16x16xf32> to vector<16x16xbf16>
    %13 = arith.truncf %1 : vector<16x8xf32> to vector<16x8xbf16>
    %cst_10 = arith.constant dense<0.000000e+00> : vector<16x8xf32>
    %14 = tpu.matmul %12, %13, %cst_10 {dimension_numbers = #tpu.dot_dimension_numbers<[1], [0], [0], [1], [0, 0, 1, 1], [], []>} : vector<16x16xbf16>, vector<16x8xbf16>, vector<16x8xf32> -> vector<16x8xf32>
    %15 = vector.broadcast %11 : vector<16x1xf32> to vector<16x8xf32>
    %16 = arith.mulf %14, %15 : vector<16x8xf32>
    %c0_11 = arith.constant 0 : index
    %c0_12 = arith.constant 0 : index
    %17 = vector.load %arg6[%c0_11, %c0_12] : memref<8x64xf32, #tpu.memory_space<vmem>>, vector<8x64xf32>
    %cst_13 = arith.constant dense<0.000000e+00> : vector<16x64xf32>
    %18 = tpu.matmul %16, %17, %cst_13 {dimension_numbers = #tpu.dot_dimension_numbers<[1], [0], [0], [1], [0, 0, 1, 1], [], []>} : vector<16x8xf32>, vector<8x64xf32>, vector<16x64xf32> -> vector<16x64xf32>
    %c0_14 = arith.constant 0 : index
    %c0_15 = arith.constant 0 : index
    %19 = vector.load %arg7[%c0_14, %c0_15] : memref<8x64xf32, #tpu.memory_space<vmem>>, vector<8x64xf32>
    %cst_16 = arith.constant dense<0.000000e+00> : vector<16x64xf32>
    %20 = tpu.matmul %1, %19, %cst_16 {dimension_numbers = #tpu.dot_dimension_numbers<[1], [0], [0], [1], [0, 0, 1, 1], [], []>} : vector<16x8xf32>, vector<8x64xf32>, vector<16x64xf32> -> vector<16x64xf32>
    %21 = arith.addf %18, %20 : vector<16x64xf32>
    %c0_17 = arith.constant 0 : index
    %c0_18 = arith.constant 0 : index
    %22 = vector.load %arg8[%c0_17, %c0_18] : memref<1x64xf32, #tpu.memory_space<vmem>>, vector<1x64xf32>
    %23 = vector.broadcast %22 : vector<1x64xf32> to vector<16x64xf32>
    %24 = arith.addf %21, %23 : vector<16x64xf32>
    %25 = vector.extract_strided_slice %24 {offsets = [0, 0], sizes = [16, 32], strides = [1, 1]} : vector<16x64xf32> to vector<16x32xf32>
    %26 = arith.mulf %25, %25 : vector<16x32xf32>
    %cst_19 = arith.constant dense<0.000000e+00> : vector<16xf32>
    %27 = vector.multi_reduction <add>, %26, %cst_19 [1] : vector<16x32xf32> to vector<16xf32>
    %28 = vector.shape_cast %27 : vector<16xf32> to vector<16x1xf32>
    %cst_20 = arith.constant 1.000000e-24 : f32
    %29 = vector.broadcast %cst_20 : f32 to vector<16x1xf32>
    %30 = arith.maximumf %28, %29 : vector<16x1xf32>
    %31 = math.rsqrt %30 : vector<16x1xf32>
    %32 = vector.broadcast %31 : vector<16x1xf32> to vector<16x32xf32>
    %33 = arith.mulf %25, %32 : vector<16x32xf32>
    %34 = vector.extract_strided_slice %24 {offsets = [0, 32], sizes = [16, 32], strides = [1, 1]} : vector<16x64xf32> to vector<16x32xf32>
    %35 = arith.mulf %34, %34 : vector<16x32xf32>
    %cst_21 = arith.constant dense<0.000000e+00> : vector<16xf32>
    %36 = vector.multi_reduction <add>, %35, %cst_21 [1] : vector<16x32xf32> to vector<16xf32>
    %37 = vector.shape_cast %36 : vector<16xf32> to vector<16x1xf32>
    %cst_22 = arith.constant 1.000000e-24 : f32
    %38 = vector.broadcast %cst_22 : f32 to vector<16x1xf32>
    %39 = arith.maximumf %37, %38 : vector<16x1xf32>
    %40 = math.rsqrt %39 : vector<16x1xf32>
    %41 = vector.broadcast %40 : vector<16x1xf32> to vector<16x32xf32>
    %42 = arith.mulf %34, %41 : vector<16x32xf32>
    %43 = vector.broadcast %5 : vector<16x1xf32> to vector<16x32xf32>
    %44 = arith.mulf %33, %43 : vector<16x32xf32>
    %45 = vector.broadcast %5 : vector<16x1xf32> to vector<16x32xf32>
    %46 = arith.mulf %42, %45 : vector<16x32xf32>
    %cst_23 = arith.constant 0.000000e+00 : f32
    %47 = vector.broadcast %cst_23 : f32 to vector<16x32xf32>
    %48 = arith.maximumf %44, %47 : vector<16x32xf32>
    %cst_24 = arith.constant 0.999994993 : f32
    %49 = vector.broadcast %cst_24 : f32 to vector<16x32xf32>
    %50 = arith.mulf %48, %49 : vector<16x32xf32>
    %cst_25 = arith.constant 0.000000e+00 : f32
    %51 = vector.broadcast %cst_25 : f32 to vector<16x32xf32>
    %52 = arith.maximumf %46, %51 : vector<16x32xf32>
    %cst_26 = arith.constant 0.999994993 : f32
    %53 = vector.broadcast %cst_26 : f32 to vector<16x32xf32>
    %54 = arith.mulf %52, %53 : vector<16x32xf32>
    %55 = tpu.concatenate %50, %54 in 1 : vector<16x32xf32>, vector<16x32xf32> -> vector<16x64xf32>
    %56 = arith.truncf %55 : vector<16x64xf32> to vector<16x64xbf16>
    %cst_27 = arith.constant dense<0.000000e+00> : vector<16x64xf32>
    %57 = tpu.matmul %12, %56, %cst_27 {dimension_numbers = #tpu.dot_dimension_numbers<[1], [0], [0], [1], [0, 0, 1, 1], [], []>} : vector<16x16xbf16>, vector<16x64xbf16>, vector<16x64xf32> -> vector<16x64xf32>
    %58 = vector.broadcast %11 : vector<16x1xf32> to vector<16x64xf32>
    %59 = arith.mulf %57, %58 : vector<16x64xf32>
    %c0_28 = arith.constant 0 : index
    %c0_29 = arith.constant 0 : index
    %60 = vector.load %arg9[%c0_28, %c0_29] : memref<64x64xf32, #tpu.memory_space<vmem>>, vector<64x64xf32>
    %cst_30 = arith.constant dense<0.000000e+00> : vector<16x64xf32>
    %61 = tpu.matmul %59, %60, %cst_30 {dimension_numbers = #tpu.dot_dimension_numbers<[1], [0], [0], [1], [0, 0, 1, 1], [], []>} : vector<16x64xf32>, vector<64x64xf32>, vector<16x64xf32> -> vector<16x64xf32>
    %c0_31 = arith.constant 0 : index
    %c0_32 = arith.constant 0 : index
    %62 = vector.load %arg10[%c0_31, %c0_32] : memref<64x64xf32, #tpu.memory_space<vmem>>, vector<64x64xf32>
    %cst_33 = arith.constant dense<0.000000e+00> : vector<16x64xf32>
    %63 = tpu.matmul %55, %62, %cst_33 {dimension_numbers = #tpu.dot_dimension_numbers<[1], [0], [0], [1], [0, 0, 1, 1], [], []>} : vector<16x64xf32>, vector<64x64xf32>, vector<16x64xf32> -> vector<16x64xf32>
    %64 = arith.addf %61, %63 : vector<16x64xf32>
    %c0_34 = arith.constant 0 : index
    %c0_35 = arith.constant 0 : index
    %65 = vector.load %arg11[%c0_34, %c0_35] : memref<1x64xf32, #tpu.memory_space<vmem>>, vector<1x64xf32>
    %66 = vector.broadcast %65 : vector<1x64xf32> to vector<16x64xf32>
    %67 = arith.addf %64, %66 : vector<16x64xf32>
    %68 = vector.extract_strided_slice %67 {offsets = [0, 0], sizes = [16, 32], strides = [1, 1]} : vector<16x64xf32> to vector<16x32xf32>
    %69 = arith.mulf %68, %68 : vector<16x32xf32>
    %cst_36 = arith.constant dense<0.000000e+00> : vector<16xf32>
    %70 = vector.multi_reduction <add>, %69, %cst_36 [1] : vector<16x32xf32> to vector<16xf32>
    %71 = vector.shape_cast %70 : vector<16xf32> to vector<16x1xf32>
    %cst_37 = arith.constant 1.000000e-24 : f32
    %72 = vector.broadcast %cst_37 : f32 to vector<16x1xf32>
    %73 = arith.maximumf %71, %72 : vector<16x1xf32>
    %74 = math.rsqrt %73 : vector<16x1xf32>
    %75 = vector.broadcast %74 : vector<16x1xf32> to vector<16x32xf32>
    %76 = arith.mulf %68, %75 : vector<16x32xf32>
    %77 = vector.extract_strided_slice %67 {offsets = [0, 32], sizes = [16, 32], strides = [1, 1]} : vector<16x64xf32> to vector<16x32xf32>
    %78 = arith.mulf %77, %77 : vector<16x32xf32>
    %cst_38 = arith.constant dense<0.000000e+00> : vector<16xf32>
    %79 = vector.multi_reduction <add>, %78, %cst_38 [1] : vector<16x32xf32> to vector<16xf32>
    %80 = vector.shape_cast %79 : vector<16xf32> to vector<16x1xf32>
    %cst_39 = arith.constant 1.000000e-24 : f32
    %81 = vector.broadcast %cst_39 : f32 to vector<16x1xf32>
    %82 = arith.maximumf %80, %81 : vector<16x1xf32>
    %83 = math.rsqrt %82 : vector<16x1xf32>
    %84 = vector.broadcast %83 : vector<16x1xf32> to vector<16x32xf32>
    %85 = arith.mulf %77, %84 : vector<16x32xf32>
    %86 = vector.broadcast %5 : vector<16x1xf32> to vector<16x32xf32>
    %87 = arith.mulf %76, %86 : vector<16x32xf32>
    %88 = vector.broadcast %5 : vector<16x1xf32> to vector<16x32xf32>
    %89 = arith.mulf %85, %88 : vector<16x32xf32>
    %cst_40 = arith.constant 0.000000e+00 : f32
    %90 = vector.broadcast %cst_40 : f32 to vector<16x32xf32>
    %91 = arith.maximumf %87, %90 : vector<16x32xf32>
    %cst_41 = arith.constant 0.999994993 : f32
    %92 = vector.broadcast %cst_41 : f32 to vector<16x32xf32>
    %93 = arith.mulf %91, %92 : vector<16x32xf32>
    %cst_42 = arith.constant 0.000000e+00 : f32
    %94 = vector.broadcast %cst_42 : f32 to vector<16x32xf32>
    %95 = arith.maximumf %89, %94 : vector<16x32xf32>
    %cst_43 = arith.constant 0.999994993 : f32
    %96 = vector.broadcast %cst_43 : f32 to vector<16x32xf32>
    %97 = arith.mulf %95, %96 : vector<16x32xf32>
    %98 = tpu.concatenate %93, %97 in 1 : vector<16x32xf32>, vector<16x32xf32> -> vector<16x64xf32>
    %99 = arith.truncf %98 : vector<16x64xf32> to vector<16x64xbf16>
    %cst_44 = arith.constant dense<0.000000e+00> : vector<16x64xf32>
    %100 = tpu.matmul %12, %99, %cst_44 {dimension_numbers = #tpu.dot_dimension_numbers<[1], [0], [0], [1], [0, 0, 1, 1], [], []>} : vector<16x16xbf16>, vector<16x64xbf16>, vector<16x64xf32> -> vector<16x64xf32>
    %101 = vector.broadcast %11 : vector<16x1xf32> to vector<16x64xf32>
    %102 = arith.mulf %100, %101 : vector<16x64xf32>
    %c0_45 = arith.constant 0 : index
    %c0_46 = arith.constant 0 : index
    %103 = vector.load %arg12[%c0_45, %c0_46] : memref<64x66xf32, #tpu.memory_space<vmem>>, vector<64x66xf32>
    %cst_47 = arith.constant dense<0.000000e+00> : vector<16x66xf32>
    %104 = tpu.matmul %102, %103, %cst_47 {dimension_numbers = #tpu.dot_dimension_numbers<[1], [0], [0], [1], [0, 0, 1, 1], [], []>} : vector<16x64xf32>, vector<64x66xf32>, vector<16x66xf32> -> vector<16x66xf32>
    %c0_48 = arith.constant 0 : index
    %c0_49 = arith.constant 0 : index
    %105 = vector.load %arg13[%c0_48, %c0_49] : memref<64x66xf32, #tpu.memory_space<vmem>>, vector<64x66xf32>
    %cst_50 = arith.constant dense<0.000000e+00> : vector<16x66xf32>
    %106 = tpu.matmul %98, %105, %cst_50 {dimension_numbers = #tpu.dot_dimension_numbers<[1], [0], [0], [1], [0, 0, 1, 1], [], []>} : vector<16x64xf32>, vector<64x66xf32>, vector<16x66xf32> -> vector<16x66xf32>
    %107 = arith.addf %104, %106 : vector<16x66xf32>
    %c0_51 = arith.constant 0 : index
    %c0_52 = arith.constant 0 : index
    %108 = vector.load %arg14[%c0_51, %c0_52] : memref<1x66xf32, #tpu.memory_space<vmem>>, vector<1x66xf32>
    %109 = vector.broadcast %108 : vector<1x66xf32> to vector<16x66xf32>
    %110 = arith.addf %107, %109 : vector<16x66xf32>
    %111 = vector.extract_strided_slice %110 {offsets = [0, 0], sizes = [16, 2], strides = [1, 1]} : vector<16x66xf32> to vector<16x2xf32>
    %112 = arith.mulf %111, %111 : vector<16x2xf32>
    %cst_53 = arith.constant dense<0.000000e+00> : vector<16xf32>
    %113 = vector.multi_reduction <add>, %112, %cst_53 [1] : vector<16x2xf32> to vector<16xf32>
    %114 = vector.shape_cast %113 : vector<16xf32> to vector<16x1xf32>
    %cst_54 = arith.constant 1.000000e-24 : f32
    %115 = vector.broadcast %cst_54 : f32 to vector<16x1xf32>
    %116 = arith.maximumf %114, %115 : vector<16x1xf32>
    %117 = math.rsqrt %116 : vector<16x1xf32>
    %118 = vector.broadcast %117 : vector<16x1xf32> to vector<16x2xf32>
    %119 = arith.mulf %111, %118 : vector<16x2xf32>
    %120 = vector.extract_strided_slice %110 {offsets = [0, 2], sizes = [16, 64], strides = [1, 1]} : vector<16x66xf32> to vector<16x64xf32>
    %121 = arith.mulf %120, %120 : vector<16x64xf32>
    %cst_55 = arith.constant dense<0.000000e+00> : vector<16xf32>
    %122 = vector.multi_reduction <add>, %121, %cst_55 [1] : vector<16x64xf32> to vector<16xf32>
    %123 = vector.shape_cast %122 : vector<16xf32> to vector<16x1xf32>
    %cst_56 = arith.constant 1.000000e-24 : f32
    %124 = vector.broadcast %cst_56 : f32 to vector<16x1xf32>
    %125 = arith.maximumf %123, %124 : vector<16x1xf32>
    %126 = math.rsqrt %125 : vector<16x1xf32>
    %127 = vector.broadcast %126 : vector<16x1xf32> to vector<16x64xf32>
    %128 = arith.mulf %120, %127 : vector<16x64xf32>
    %129 = vector.broadcast %5 : vector<16x1xf32> to vector<16x2xf32>
    %130 = arith.mulf %119, %129 : vector<16x2xf32>
    %131 = vector.broadcast %5 : vector<16x1xf32> to vector<16x64xf32>
    %132 = arith.mulf %128, %131 : vector<16x64xf32>
    %133 = tpu.concatenate %50, %93, %130 in 1 : vector<16x32xf32>, vector<16x32xf32>, vector<16x2xf32> -> vector<16x66xf32>
    %c0_57 = arith.constant 0 : index
    %c0_58 = arith.constant 0 : index
    %134 = vector.load %arg15[%c0_57, %c0_58] : memref<66x2xf32, #tpu.memory_space<vmem>>, vector<66x2xf32>
    %cst_59 = arith.constant dense<0.000000e+00> : vector<16x2xf32>
    %135 = tpu.matmul %133, %134, %cst_59 {dimension_numbers = #tpu.dot_dimension_numbers<[1], [0], [0], [1], [0, 0, 1, 1], [], []>} : vector<16x66xf32>, vector<66x2xf32>, vector<16x2xf32> -> vector<16x2xf32>
    %c0_60 = arith.constant 0 : index
    %c0_61 = arith.constant 0 : index
    %136 = vector.load %arg16[%c0_60, %c0_61] : memref<1x2xf32, #tpu.memory_space<vmem>>, vector<1x2xf32>
    %137 = vector.broadcast %136 : vector<1x2xf32> to vector<16x2xf32>
    %138 = arith.addf %135, %137 : vector<16x2xf32>
    %cst_62 = arith.constant dense<0xFF800000> : vector<16xf32>
    %139 = vector.multi_reduction <maximumf>, %138, %cst_62 [1] : vector<16x2xf32> to vector<16xf32>
    %140 = vector.shape_cast %139 : vector<16xf32> to vector<16x1xf32>
    %141 = vector.broadcast %140 : vector<16x1xf32> to vector<16x2xf32>
    %142 = arith.subf %138, %141 : vector<16x2xf32>
    %143 = math.exp %142 : vector<16x2xf32>
    %cst_63 = arith.constant dense<0.000000e+00> : vector<16xf32>
    %144 = vector.multi_reduction <add>, %143, %cst_63 [1] : vector<16x2xf32> to vector<16xf32>
    %145 = vector.shape_cast %144 : vector<16xf32> to vector<16x1xf32>
    %146 = vector.broadcast %145 : vector<16x1xf32> to vector<16x2xf32>
    %147 = arith.divf %143, %146 : vector<16x2xf32>
    %148 = vector.broadcast %5 : vector<16x1xf32> to vector<16x2xf32>
    %149 = arith.mulf %147, %148 : vector<16x2xf32>
    %150 = tpu.concatenate %54, %97, %132 in 1 : vector<16x32xf32>, vector<16x32xf32>, vector<16x64xf32> -> vector<16x128xf32>
    "tpu.trace_start"() <{level = 10 : i32, message = "nk,nc->kc"}> : () -> ()
    %cst_64 = arith.constant dense<0.000000e+00> : vector<2x128xf32>
    %151 = tpu.matmul %149, %150, %cst_64 {dimension_numbers = #tpu.dot_dimension_numbers<[0], [0], [1], [1], [0, 1, 1, 1], [], []>} : vector<16x2xf32>, vector<16x128xf32>, vector<2x128xf32> -> vector<2x128xf32>
    "tpu.trace_stop"() : () -> ()
    %c0_65 = arith.constant 0 : index
    %c0_66 = arith.constant 0 : index
    %c0_67 = arith.constant 0 : index
    %152 = vector.load %arg17[%c0_65, %c0_66, %c0_67] : memref<1x2x128xf32, #tpu.memory_space<vmem>>, vector<1x2x128xf32>
    %153 = vector.shape_cast %152 : vector<1x2x128xf32> to vector<2x128xf32>
    %154 = vector.shape_cast %151 : vector<2x128xf32> to vector<1x2x128xf32>
    tpu.vector_store %arg17[%c0_65, %c0_66, %c0_67], %154 {strides = array<i32>} : memref<1x2x128xf32, #tpu.memory_space<vmem>>, vector<1x2x128xf32>,
    %cst_68 = arith.constant dense<0xFF800000> : vector<128xf32>
    %155 = vector.multi_reduction <maximumf>, %151, %cst_68 [0] : vector<2x128xf32> to vector<128xf32>
    %156 = vector.shape_cast %155 : vector<128xf32> to vector<1x128xf32>
    %c0_69 = arith.constant 0 : index
    %c0_70 = arith.constant 0 : index
    %c0_71 = arith.constant 0 : index
    %157 = vector.load %arg19[%c0_69, %c0_70, %c0_71] : memref<1x1x128xf32, #tpu.memory_space<vmem>>, vector<1x1x128xf32>
    %158 = vector.shape_cast %157 : vector<1x1x128xf32> to vector<1x128xf32>
    %159 = vector.shape_cast %156 : vector<1x128xf32> to vector<1x1x128xf32>
    tpu.vector_store %arg19[%c0_69, %c0_70, %c0_71], %159 {strides = array<i32>} : memref<1x1x128xf32, #tpu.memory_space<vmem>>, vector<1x1x128xf32>,
    "tpu.trace_start"() <{level = 10 : i32, message = "nk,nm->km"}> : () -> ()
    %cst_72 = arith.constant dense<0.000000e+00> : vector<2x16xf32>
    %160 = tpu.matmul %149, %3, %cst_72 {dimension_numbers = #tpu.dot_dimension_numbers<[0], [0], [1], [1], [0, 1, 1, 1], [], []>} : vector<16x2xf32>, vector<16x16xf32>, vector<2x16xf32> -> vector<2x16xf32>
    "tpu.trace_stop"() : () -> ()
    %cst_73 = arith.constant dense<0.000000e+00> : vector<2x2xf32>
    %161 = tpu.matmul %160, %149, %cst_73 {dimension_numbers = #tpu.dot_dimension_numbers<[1], [0], [0], [1], [0, 0, 1, 1], [], []>} : vector<2x16xf32>, vector<16x2xf32>, vector<2x2xf32> -> vector<2x2xf32>
    %162 = tpu.iota {dimensions = array<i32: 0>} : vector<2x2xi32>
    %163 = tpu.iota {dimensions = array<i32: 1>} : vector<2x2xi32>
    %164 = arith.cmpi eq, %162, %163 : vector<2x2xi32>
    %165 = arith.extui %164 : vector<2x2xi1> to vector<2x2xi32>
    %166 = arith.sitofp %165 : vector<2x2xi32> to vector<2x2xf32>
    %167 = arith.mulf %3, %3 : vector<16x16xf32>
    %cst_74 = arith.constant dense<0.000000e+00> : vector<16xf32>
    %168 = vector.multi_reduction <add>, %167, %cst_74 [1] : vector<16x16xf32> to vector<16xf32>
    %169 = vector.shape_cast %168 : vector<16xf32> to vector<16x1xf32>
    %cst_75 = arith.constant dense<0.000000e+00> : vector<1xf32>
    %170 = vector.multi_reduction <add>, %169, %cst_75 [0] : vector<16x1xf32> to vector<1xf32>
    %171 = vector.shape_cast %170 : vector<1xf32> to vector<1x1xf32>
    %172 = arith.mulf %161, %166 : vector<2x2xf32>
    %cst_76 = arith.constant dense<0.000000e+00> : vector<2xf32>
    %173 = vector.multi_reduction <add>, %172, %cst_76 [1] : vector<2x2xf32> to vector<2xf32>
    %174 = vector.shape_cast %173 : vector<2xf32> to vector<2x1xf32>
    %cst_77 = arith.constant dense<0.000000e+00> : vector<1xf32>
    %175 = vector.multi_reduction <add>, %174, %cst_77 [0] : vector<2x1xf32> to vector<1xf32>
    %176 = vector.shape_cast %175 : vector<1xf32> to vector<1x1xf32>
    "tpu.trace_start"() <{level = 10 : i32, message = "nk,nl->kl"}> : () -> ()
    %cst_78 = arith.constant dense<0.000000e+00> : vector<2x2xf32>
    %177 = tpu.matmul %149, %149, %cst_78 {dimension_numbers = #tpu.dot_dimension_numbers<[0], [0], [1], [1], [0, 1, 1, 1], [], []>} : vector<16x2xf32>, vector<16x2xf32>, vector<2x2xf32> -> vector<2x2xf32>
    "tpu.trace_stop"() : () -> ()
    %178 = arith.mulf %177, %177 : vector<2x2xf32>
    %cst_79 = arith.constant dense<0.000000e+00> : vector<2xf32>
    %179 = vector.multi_reduction <add>, %178, %cst_79 [1] : vector<2x2xf32> to vector<2xf32>
    %180 = vector.shape_cast %179 : vector<2xf32> to vector<2x1xf32>
    %cst_80 = arith.constant dense<0.000000e+00> : vector<1xf32>
    %181 = vector.multi_reduction <add>, %180, %cst_80 [0] : vector<2x1xf32> to vector<1xf32>
    %182 = vector.shape_cast %181 : vector<1xf32> to vector<1x1xf32>
    %cst_81 = arith.constant 2.000000e+00 : f32
    %183 = vector.broadcast %cst_81 : f32 to vector<1x1xf32>
    %184 = arith.mulf %183, %176 : vector<1x1xf32>
    %185 = arith.subf %171, %184 : vector<1x1xf32>
    %186 = arith.addf %185, %182 : vector<1x1xf32>
    %cst_82 = arith.constant 0.000000e+00 : f32
    %187 = vector.broadcast %cst_82 : f32 to vector<1x1xf32>
    %188 = arith.maximumf %186, %187 : vector<1x1xf32>
    %cst_83 = arith.constant 0.000000e+00 : f32
    %189 = vector.broadcast %cst_83 : f32 to vector<16x2xf32>
    %190 = arith.subf %189, %149 : vector<16x2xf32>
    %cst_84 = arith.constant 1.000000e-15 : f32
    %191 = vector.broadcast %cst_84 : f32 to vector<16x2xf32>
    %192 = arith.addf %149, %191 : vector<16x2xf32>
    %193 = math.log %192 : vector<16x2xf32>
    %194 = arith.mulf %190, %193 : vector<16x2xf32>
    %cst_85 = arith.constant dense<0.000000e+00> : vector<16xf32>
    %195 = vector.multi_reduction <add>, %194, %cst_85 [1] : vector<16x2xf32> to vector<16xf32>
    %196 = vector.shape_cast %195 : vector<16xf32> to vector<16x1xf32>
    %cst_86 = arith.constant dense<0.000000e+00> : vector<1xf32>
    %197 = vector.multi_reduction <add>, %196, %cst_86 [0] : vector<16x1xf32> to vector<1xf32>
    %198 = vector.shape_cast %197 : vector<1xf32> to vector<1x1xf32>
    %199 = tpu.concatenate %188, %198 in 1 : vector<1x1xf32>, vector<1x1xf32> -> vector<1x2xf32>
    %c0_87 = arith.constant 0 : index
    %c0_88 = arith.constant 0 : index
    %c0_89 = arith.constant 0 : index
    %200 = vector.load %arg20[%c0_87, %c0_88, %c0_89] : memref<1x1x2xf32, #tpu.memory_space<vmem>>, vector<1x1x2xf32>
    %201 = vector.shape_cast %200 : vector<1x1x2xf32> to vector<1x2xf32>
    %202 = vector.shape_cast %199 : vector<1x2xf32> to vector<1x1x2xf32>
    tpu.vector_store %arg20[%c0_87, %c0_88, %c0_89], %202 {strides = array<i32>} : memref<1x1x2xf32, #tpu.memory_space<vmem>>, vector<1x1x2xf32>,
    %cst_90 = arith.constant dense<0x7F800000> : vector<2xf32>
    %203 = vector.multi_reduction <minimumf>, %161, %cst_90 [1] : vector<2x2xf32> to vector<2xf32>
    %204 = vector.shape_cast %203 : vector<2xf32> to vector<2x1xf32>
    %cst_91 = arith.constant dense<0x7F800000> : vector<1xf32>
    %205 = vector.multi_reduction <minimumf>, %204, %cst_91 [0] : vector<2x1xf32> to vector<1xf32>
    %206 = vector.shape_cast %205 : vector<1xf32> to vector<1x1xf32>
    %cst_92 = arith.constant dense<0xFF800000> : vector<2xf32>
    %207 = vector.multi_reduction <maximumf>, %161, %cst_92 [1] : vector<2x2xf32> to vector<2xf32>
    %208 = vector.shape_cast %207 : vector<2xf32> to vector<2x1xf32>
    %cst_93 = arith.constant dense<0xFF800000> : vector<1xf32>
    %209 = vector.multi_reduction <maximumf>, %208, %cst_93 [0] : vector<2x1xf32> to vector<1xf32>
    %210 = vector.shape_cast %209 : vector<1xf32> to vector<1x1xf32>
    %211 = vector.broadcast %206 : vector<1x1xf32> to vector<2x2xf32>
    %212 = arith.subf %161, %211 : vector<2x2xf32>
    %213 = arith.subf %210, %206 : vector<1x1xf32>
    %cst_94 = arith.constant 9.99999996E-13 : f32
    %214 = vector.broadcast %cst_94 : f32 to vector<1x1xf32>
    %215 = arith.maximumf %213, %214 : vector<1x1xf32>
    %216 = vector.broadcast %215 : vector<1x1xf32> to vector<2x2xf32>
    %217 = arith.divf %212, %216 : vector<2x2xf32>
    %c0_95 = arith.constant 0 : index
    %c0_96 = arith.constant 0 : index
    %c0_97 = arith.constant 0 : index
    %218 = vector.load %arg4[%c0_95, %c0_96, %c0_97] : memref<1x2x2xf32, #tpu.memory_space<vmem>>, vector<1x2x2xf32>
    %219 = vector.shape_cast %218 : vector<1x2x2xf32> to vector<2x2xf32>
    %220 = arith.addf %217, %219 : vector<2x2xf32>
    %cst_98 = arith.constant 1.000000e+00 : f32
    %221 = vector.broadcast %cst_98 : f32 to vector<2x2xf32>
    %222 = arith.subf %221, %217 : vector<2x2xf32>
    %c0_99 = arith.constant 0 : index
    %c0_100 = arith.constant 0 : index
    %c0_101 = arith.constant 0 : index
    %223 = vector.load %arg5[%c0_99, %c0_100, %c0_101] : memref<1x2x2xf32, #tpu.memory_space<vmem>>, vector<1x2x2xf32>
    %224 = vector.shape_cast %223 : vector<1x2x2xf32> to vector<2x2xf32>
    %225 = arith.addf %222, %224 : vector<2x2xf32>
    %226 = arith.cmpf ogt, %220, %225 : vector<2x2xf32>
    %227 = arith.extui %226 : vector<2x2xi1> to vector<2x2xi32>
    %228 = arith.sitofp %227 : vector<2x2xi32> to vector<2x2xf32>
    %cst_102 = arith.constant 0.000000e+00 : f32
    %229 = vector.broadcast %cst_102 : f32 to vector<2x2xf32>
    %230 = arith.cmpf ogt, %166, %229 : vector<2x2xf32>
    %cst_103 = arith.constant 1.000000e+00 : f32
    %231 = vector.broadcast %cst_103 : f32 to vector<2x2xf32>
    %232 = arith.select %230, %231, %228 : vector<2x2xi1>, vector<2x2xf32>
    %c0_104 = arith.constant 0 : index
    %c0_105 = arith.constant 0 : index
    %c0_106 = arith.constant 0 : index
    %233 = vector.load %arg18[%c0_104, %c0_105, %c0_106] : memref<1x2x2xf32, #tpu.memory_space<vmem>>, vector<1x2x2xf32>
    %234 = vector.shape_cast %233 : vector<1x2x2xf32> to vector<2x2xf32>
    %235 = vector.shape_cast %232 : vector<2x2xf32> to vector<1x2x2xf32>
    tpu.vector_store %arg18[%c0_104, %c0_105, %c0_106], %235 {strides = array<i32>} : memref<1x2x2xf32, #tpu.memory_space<vmem>>, vector<1x2x2xf32>,
    return
  }
  func.func @transform_0(%arg0: i32) -> (i32, i32, i32) {
    %c0_i32 = arith.constant 0 : i32
    %c0_i32_0 = arith.constant 0 : i32
    %c0_i32_1 = arith.constant 0 : i32
    return %arg0, %c0_i32, %c0_i32_0 : i32, i32, i32
  }
  func.func @transform_1(%arg0: i32) -> (i32, i32, i32) {
    %c0_i32 = arith.constant 0 : i32
    %c0_i32_0 = arith.constant 0 : i32
    %c0_i32_1 = arith.constant 0 : i32
    return %arg0, %c0_i32, %c0_i32_0 : i32, i32, i32
  }
  func.func @transform_2(%arg0: i32) -> (i32, i32, i32) {
    %c0_i32 = arith.constant 0 : i32
    %c0_i32_0 = arith.constant 0 : i32
    %c0_i32_1 = arith.constant 0 : i32
    return %arg0, %c0_i32, %c0_i32_0 : i32, i32, i32
  }
  func.func @transform_3(%arg0: i32) -> (i32, i32, i32) {
    %c0_i32 = arith.constant 0 : i32
    %c0_i32_0 = arith.constant 0 : i32
    %c0_i32_1 = arith.constant 0 : i32
    return %arg0, %c0_i32, %c0_i32_0 : i32, i32, i32
  }
  func.func @transform_4(%arg0: i32) -> (i32, i32, i32) {
    %c0_i32 = arith.constant 0 : i32
    %c0_i32_0 = arith.constant 0 : i32
    %c0_i32_1 = arith.constant 0 : i32
    return %arg0, %c0_i32, %c0_i32_0 : i32, i32, i32
  }
  func.func @transform_5(%arg0: i32) -> (i32, i32) {
    %c0_i32 = arith.constant 0 : i32
    %c0_i32_0 = arith.constant 0 : i32
    %c0_i32_1 = arith.constant 0 : i32
    return %c0_i32, %c0_i32_0 : i32, i32
  }
  func.func @transform_6(%arg0: i32) -> (i32, i32) {
    %c0_i32 = arith.constant 0 : i32
    %c0_i32_0 = arith.constant 0 : i32
    %c0_i32_1 = arith.constant 0 : i32
    return %c0_i32, %c0_i32_0 : i32, i32
  }
  func.func @transform_7(%arg0: i32) -> (i32, i32) {
    %c0_i32 = arith.constant 0 : i32
    %c0_i32_0 = arith.constant 0 : i32
    %c0_i32_1 = arith.constant 0 : i32
    return %c0_i32, %c0_i32_0 : i32, i32
  }
  func.func @transform_8(%arg0: i32) -> (i32, i32) {
    %c0_i32 = arith.constant 0 : i32
    %c0_i32_0 = arith.constant 0 : i32
    %c0_i32_1 = arith.constant 0 : i32
    return %c0_i32, %c0_i32_0 : i32, i32
  }
  func.func @transform_9(%arg0: i32) -> (i32, i32) {
    %c0_i32 = arith.constant 0 : i32
    %c0_i32_0 = arith.constant 0 : i32
    %c0_i32_1 = arith.constant 0 : i32
    return %c0_i32, %c0_i32_0 : i32, i32
  }
  func.func @transform_10(%arg0: i32) -> (i32, i32) {
    %c0_i32 = arith.constant 0 : i32
    %c0_i32_0 = arith.constant 0 : i32
    %c0_i32_1 = arith.constant 0 : i32
    return %c0_i32, %c0_i32_0 : i32, i32
  }
  func.func @transform_11(%arg0: i32) -> (i32, i32) {
    %c0_i32 = arith.constant 0 : i32
    %c0_i32_0 = arith.constant 0 : i32
    %c0_i32_1 = arith.constant 0 : i32
    return %c0_i32, %c0_i32_0 : i32, i32
  }
  func.func @transform_12(%arg0: i32) -> (i32, i32) {
    %c0_i32 = arith.constant 0 : i32
    %c0_i32_0 = arith.constant 0 : i32
    %c0_i32_1 = arith.constant 0 : i32
    return %c0_i32, %c0_i32_0 : i32, i32
  }
  func.func @transform_13(%arg0: i32) -> (i32, i32) {
    %c0_i32 = arith.constant 0 : i32
    %c0_i32_0 = arith.constant 0 : i32
    %c0_i32_1 = arith.constant 0 : i32
    return %c0_i32, %c0_i32_0 : i32, i32
  }
  func.func @transform_14(%arg0: i32) -> (i32, i32) {
    %c0_i32 = arith.constant 0 : i32
    %c0_i32_0 = arith.constant 0 : i32
    %c0_i32_1 = arith.constant 0 : i32
    return %c0_i32, %c0_i32_0 : i32, i32
  }
  func.func @transform_15(%arg0: i32) -> (i32, i32) {
    %c0_i32 = arith.constant 0 : i32
    %c0_i32_0 = arith.constant 0 : i32
    %c0_i32_1 = arith.constant 0 : i32
    return %c0_i32, %c0_i32_0 : i32, i32
  }
  func.func @transform_16(%arg0: i32) -> (i32, i32, i32) {
    %c0_i32 = arith.constant 0 : i32
    %c0_i32_0 = arith.constant 0 : i32
    %c0_i32_1 = arith.constant 0 : i32
    return %arg0, %c0_i32, %c0_i32_0 : i32, i32, i32
  }
  func.func @transform_17(%arg0: i32) -> (i32, i32, i32) {
    %c0_i32 = arith.constant 0 : i32
    %c0_i32_0 = arith.constant 0 : i32
    %c0_i32_1 = arith.constant 0 : i32
    return %arg0, %c0_i32, %c0_i32_0 : i32, i32, i32
  }
  func.func @transform_18(%arg0: i32) -> (i32, i32, i32) {
    %c0_i32 = arith.constant 0 : i32
    %c0_i32_0 = arith.constant 0 : i32
    %c0_i32_1 = arith.constant 0 : i32
    return %arg0, %c0_i32, %c0_i32_0 : i32, i32, i32
  }
  func.func @transform_19(%arg0: i32) -> (i32, i32, i32) {
    %c0_i32 = arith.constant 0 : i32
    %c0_i32_0 = arith.constant 0 : i32
    %c0_i32_1 = arith.constant 0 : i32
    return %arg0, %c0_i32, %c0_i32_0 : i32, i32, i32
  }
}

</mosaic_0001>

<bundles_post_ra>
// kernel: tpu_custom_call.1
= control target key start
LH: loop header
LB: loop body
LE: loop exit
PB: predicated region body
PF: predicated region fallthrough
CT: control target
= control target key end

     0   :  { %s4482_s0 = inlined_call_operand.vmem [shape: f32[2,16,8], index: 0, kind: input, shape index: {}]   ;;  %s4483_s1 = inlined_call_operand.hbm [shape: f32[2,16,16], index: 1, kind: input, shape index: {}]   ;;  %s4484_s2 = inlined_call_operand.vmem [shape: f32[2,16,1], index: 2, kind: input, shape index: {}]   ;;  %s4485_s3 = inlined_call_operand.hbm [shape: f32[2,2,2], index: 3, kind: input, shape index: {}]   ;;  %s4486_s4 = inlined_call_operand.hbm [shape: f32[2,2,2], index: 4, kind: input, shape index: {}]   ;;  %s4487_s5 = inlined_call_operand.hbm [shape: f32[8,64], index: 5, kind: input, shape index: {}]   ;;  %s4488_s6 = inlined_call_operand.hbm [shape: f32[8,64], index: 6, kind: input, shape index: {}]   ;;  %s4489_s7 = inlined_call_operand.vmem [shape: f32[1,64], index: 7, kind: input, shape index: {}]   ;;  %s4490_s8 = inlined_call_operand.vmem [shape: f32[64,64], index: 8, kind: input, shape index: {}]   ;;  %s4491_s9 = inlined_call_operand.vmem [shape: f32[64,64], index: 9, kind: input, shape index: {}]   ;;  %s4492_s10 = inlined_call_operand.hbm [shape: f32[1,64], index: 10, kind: input, shape index: {}]   ;;  %s4493_s11 = inlined_call_operand.vmem [shape: f32[64,66], index: 11, kind: input, shape index: {}]   ;;  %s4494_s12 = inlined_call_operand.hbm [shape: f32[64,66], index: 12, kind: input, shape index: {}]   ;;  %s4495_s13 = inlined_call_operand.vmem [shape: f32[1,66], index: 13, kind: input, shape index: {}]   ;;  %s4496_s14 = inlined_call_operand.vmem [shape: f32[66,2], index: 14, kind: input, shape index: {}]   ;;  %s4497_s15 = inlined_call_operand.vmem [shape: f32[1,2], index: 15, kind: input, shape index: {}]   ;;  %s4498_s16 = inlined_call_operand.hbm [shape: f32[2,2,128], index: 16, kind: output, shape index: {0}]   ;;  %s4499_s17 = inlined_call_operand.hbm [shape: f32[2,2,2], index: 17, kind: output, shape index: {1}]   ;;  %s4500_s18 = inlined_call_operand.hbm [shape: f32[2,1,128], index: 18, kind: output, shape index: {2}]   ;;  %s4501_s19 = inlined_call_operand.hbm [shape: f32[2,1,2], index: 19, kind: output, shape index: {3}]  }
   0x1   :  { %4537 = sst [smem:[#allocation33_spill]] %s4482_s0 }
   0x2   :  { %4538 = sst [smem:[#allocation34_spill]] %s4483_s1 }
   0x3   :  { %4539 = sst [smem:[#allocation35_spill]] %s4484_s2 }
   0x4   :  { %4540 = sst [smem:[#allocation36_spill]] %s4485_s3 }
   0x5   :  { %4541 = sst [smem:[#allocation37_spill]] %s4486_s4 }
   0x6   :  { %4542 = sst [smem:[#allocation38_spill]] %s4487_s5 }
   0x7   :  { %4543 = sst [smem:[#allocation39_spill]] %s4488_s6 }
   0x8   :  { %4544 = sst [smem:[#allocation40_spill]] %s4489_s7 }
   0x9   :  { %4545 = sst [smem:[#allocation41_spill]] %s4490_s8 }
   0xa   :  { %4546 = sst [smem:[#allocation42_spill]] %s4491_s9 }
   0xb   :  { %4547 = sst [smem:[#allocation43_spill]] %s4492_s10 }
   0xc   :  { %4548 = sst [smem:[#allocation44_spill]] %s4493_s11 }
   0xd   :  { %4549 = sst [smem:[#allocation45_spill]] %s4495_s13 }
   0xe   :  { %4550 = sst [smem:[#allocation46_spill]] %s4496_s14 }
   0xf   :  { %4551 = sst [smem:[#allocation47_spill]] %s4497_s15 }
  0x10   :  { %4552 = sst [smem:[#allocation48_spill]] %s4498_s16 }
  0x11   :  { %4553 = sst [smem:[#allocation49_spill]] %s4499_s17 }
  0x12   :  { %4554 = sst [smem:[#allocation50_spill]] %s4500_s18 }
  0x13   :  { %4555 = sst [smem:[#allocation51_spill]] %s4501_s19 }
  0x14   :  { %25 = vsyncpa [#allocation3], 0 }
  0x15   :  { %27 = vsyncpa [#allocation3 + $0x1], 0 }
  0x16   :  { %28 = vsyncpa [#allocation6], 0 }
  0x17   :  { %30 = vsyncpa [#allocation6 + $0x1], 0 }
  0x18   :  { %31 = vsyncpa [#allocation9], 0 }
  0x19   :  { %32 = vsyncpa [#allocation12], 0 }
  0x1a   :  { %33 = vsyncpa [#allocation4], 0 }
  0x1b   :  { %35 = vsyncpa [#allocation4 + $0x1], 0 }
  0x1c   :  { %36 = vsyncpa [#allocation16], 0 }
  0x1d   :  { %38 = vsyncpa [#allocation16 + $0x1], 0 }
  0x1e   :  { %39 = vsyncpa [#allocation19], 0 }
  0x1f   :  { %41 = vsyncpa [#allocation19 + $0x1], 0  ;;  %s3658_s0 = smov 0   ;;  %s3660_s30 = smov 0  }
  0x20   :  { %s3662_s20 = smov 0   ;;  %s3664_s21 = smov 0  }
  0x21 LB: > { %4556 = sst [smem:[#allocation27_spill]] %s3522_s0  ;;  %s3536_s1 = smov [#allocation8]   ;;  %s3534_s21 = sphi %s3664_s21, %s4616_s21   ;;  %s3530_s20 = sphi %s3662_s20, %s4618_s20   ;;  %s3526_s30 = sphi %s3660_s30, %s4620_s30   ;;  %s3522_s0 = sphi %s3658_s0, %s4619_s0  }
  0x22   : > { %4557 = sst [smem:[#allocation28_spill]] %s3530_s20  ;;  %s530_s22 = sshll.u32 %s3536_s1, 4  ;;  %s531_s22 = int_to_ptr.vmem [resolvable:$true] %s530_s22 }
  0x23   : > { %s3679_s2 = sadd.s32 4294967295, %s3534_s21   ;;  %p2593_p0 = scmp.ge.s32.totalorder %s3534_s21, 1 }
  0x24   : > { %p4506_p1 = scmp.eq.s32.totalorder %s3679_s2, 0  ;;  %p517_p2 = scmp.lt.s32.totalorder %s3534_s21, 3 }
  0x25   : > { %s3537_s24 = smov [#allocation11]   ;;  %s4560_s5 = sld [smem:[#allocation38_spill]] }
  0x26   : > { %p3684_p3 = pnand %p2593_p0, %p517_p2  ;;  %s561_s25 = sshll.u32 %s3537_s24, 4  ;;  %s3691_s25 = int_to_ptr.vmem [resolvable:$true] %s561_s25 }
  0x28   : > { %s4558_s23 = scalar_select %p3684_p3, 1, 0 }
  0x29   : > { %p3015_p5 = pneg %p3684_p3 }
  0x2b   : > { %p3695_p6 = pnand %p3015_p5, %p4506_p1  ;;  %s3162_s28 = scalar_lea.hbm %s4560_s5, 128 }
  0x2c   : > { %p3163_p7 = scmp.ne.s32.totalorder %s4560_s5, %s3162_s28  ;;  %p3169_p11 = scmp.lt.u32.totalorder %s3162_s28, %s4560_s5 }
  0x2d   : > { %s4559_s3 = scalar_select %p3695_p6, 1, 0 }
  0x2e   : > { %p3707_p8 = pneg %p3695_p6 }
  0x30   : > { %s4561_s18 = scalar_select %p3707_p8, 1, 0 }
  0x31   : > { %p3165_p9 = pnand %p3707_p8, %p3163_p7 }
  0x33   : > { %p3166_p10 = pneg %p3165_p9 }
  0x35   : > { %p3171_p12 = pnand %p3169_p11, %p3166_p10 }
  0x37   : > { %3174 = shalt.err (!%p3171_p12)
}
  0x38   : > { %s3175_s26 = scalar_lea.vmem %s531_s22, 128  ;;  %p3183_p5 = scmp.lt.s32.totalorder %s531_s22, %s531_s22 }
  0x39   : > { %p3176_p13 = scmp.ne.s32.totalorder %s531_s22, %s3175_s26  ;;  %p3184_p4 = scmp.lt.s32.totalorder %s3175_s26, %s3175_s26 }
  0x3b   : > { %p3178_p0 = pnand %p3176_p13, %p3707_p8  ;;  %p3185_p1 = por %p3184_p4, %p3183_p5 }
  0x3d   : > { %p3179_p2 = pneg %p3178_p0 }
  0x3f   : > { %p3186_p3 = pnand %p3185_p1, %p3179_p2 }
  0x41   : > { %3189 = shalt.err (!%p3186_p3)
}
  0x42   : > { %3018 = dma.hbm_to_vmem [thread:$0]  (!%p3695_p6), %s4560_s5, 128, %s531_s22, [#allocation9]  }
  0x43   : > { %s4562_s10 = sld [smem:[#allocation43_spill]] }
  0x49   : > { %s3190_s1 = scalar_lea.hbm %s4562_s10, 16 }
  0x4a   : > { %p3191_p7 = scmp.ne.s32.totalorder %s4562_s10, %s3190_s1  ;;  %p3197_p1 = scmp.lt.u32.totalorder %s3190_s1, %s4562_s10 }
  0x4c   : > { %p3193_p9 = pnand %p3191_p7, %p3707_p8 }
  0x4e   : > { %p3194_p4 = pneg %p3193_p9 }
  0x50   : > { %p3199_p3 = pnand %p3197_p1, %p3194_p4 }
  0x52   : > { %3202 = shalt.err (!%p3199_p3)
}
  0x53   : > { %s3203_s22 = scalar_lea.vmem %s3691_s25, 16  ;;  %s3210_s19 = scalar_lea.vmem %s3691_s25, 32 }
  0x54   : > { %p3204_p10 = scmp.ne.s32.totalorder %s3691_s25, %s3203_s22  ;;  %p3211_p13 = scmp.lt.s32.totalorder %s3691_s25, %s3691_s25 }
  0x55   : > { %p3212_p0 = scmp.lt.s32.totalorder %s3210_s19, %s3203_s22 }
  0x56   : > { %p3206_p11 = pnand %p3204_p10, %p3707_p8 }
  0x57   : > { %p3213_p2 = por %p3212_p0, %p3211_p13 }
  0x58   : > { %p3207_p12 = pneg %p3206_p11 }
  0x5a   : > { %p3214_p5 = pnand %p3213_p2, %p3207_p12 }
  0x5c   : > { %3217 = shalt.err (!%p3214_p5)
}
  0x5d   : > { %3024 = dma.hbm_to_vmem [thread:$0]  (!%p3695_p6), %s4562_s10, 16, %s3691_s25, [#allocation12]  }
  0x5e   : > { %s4510_s29 = sadd.s32 4294967294, %s3534_s21   ;;  %s3749_s17 = sadd.s32 1, %s3534_s21  }
  0x5f   : > { %4563 = sst [smem:[#allocation29_spill]] %s3749_s17  ;;  %s77_s28 = ssub.s32 %s3534_s21, %s3749_s17 }
  0x60   : > { %s80_s1 = sadd.s32 1, %s3530_s20  ;;  %p78_p7 = scmp.eq.s32.totalorder %s77_s28, 0 }
  0x61   : > { %p87_p9 = scmp.ne.s32.totalorder %s3530_s20, %s3526_s30  ;;  %p88_p4 = scmp.eq.s32.totalorder %s3534_s21, 0 }
  0x62   : > { %p93_p1 = scmp.ne.s32.totalorder %s3526_s30, %s3522_s0  ;;  %p4565_p10 = scmp.eq.s32.totalorder %s3679_s2, 0 }
  0x63   : > { %s3760_s24 = scalar_select %p78_p7, %s3530_s20, %s80_s1  }
  0x64   : > { %p89_p3 = por %p88_p4, %p87_p9  ;;  %p3764_p11 = por %p4565_p10, %p93_p1 }
  0x65   : > { %4564 = sst [smem:[#allocation30_spill]] %s3760_s24  ;;  %p426_p12 = scmp.eq.s32.totalorder %s3679_s2, 1 }
  0x66   : > { %s4566_s26 = scalar_select %p3764_p11, 1, 0 }
  0x67   : > { %p432_p13 = scmp.eq.s32.totalorder %s4510_s29, 1  ;;  %p3055_p0 = scmp.lt.s32.totalorder %s3534_s21, 2 }
  0x68   : > { %s3773_s25 = sand.u32 1, %s3530_s20   ;;  %p3775_p2 = por %p426_p12, %p87_p9 }
  0x69   : > { %p3779_p5 = por %p432_p13, %p93_p1  ;;  %p3783_p7 = pnand %p3055_p0, %p89_p3 }
  0x6a   : > { %s4567_s22 = scalar_select %p3775_p2, 1, 0 }
  0x6b   : > { %s4569_s19 = scalar_select %p3779_p5, 1, 0 }
  0x6c   : > { %4568 = sst [smem:[#allocation31_spill]] %s4567_s22  ;;  %s634_s27 = sand.u32 1, %s3534_s21  }
  0x6d   : > { %4570 = sst [smem:[#allocation32_spill]] %s4569_s19  ;;  %s4518_s28 = sshll.u32 %s3773_s25, 1 }
  0x6e   : > { %s4571_s16 = scalar_select %p3783_p7, 1, 0 }
  0x6f   : > { %s4519_s1 = sshll.u32 %s3534_s21, 5  ;;  %s638_s29 = scalar_lea.vmem [#allocation5], %s4518_s28 }
  0x70   : > { %s645_s5 = sshll.u32 %s638_s29, 4  ;;  %s4572_s20 = sld [smem:[#allocation36_spill]]  ;;  %s3799_s5 = int_to_ptr.vmem [resolvable:$true] %s645_s5 }
  0x71   : > { %s3801_s19 = scalar_lea.sflag [#allocation6], %s634_s27  ;;  %p3807_p4 = pneg %p3783_p7 }
  0x76   : > { %s4573_s17 = smov %s4572_s20  ;;  %s3797_s0 = scalar_lea.hbm %s4572_s20, %s4519_s1 }
  0x77   : > { %s3218_s22 = scalar_lea.hbm %s3797_s0, 32  ;;  %s3223_s29 = scalar_lea.hbm %s4573_s17, 64 }
  0x78   : > { %p3219_p9 = scmp.ne.s32.totalorder %s3797_s0, %s3218_s22  ;;  %p3224_p10 = scmp.lt.u32.totalorder %s3797_s0, %s4573_s17 }
  0x79   : > { %p3225_p12 = scmp.lt.u32.totalorder %s3223_s29, %s3218_s22  ;;  %p3227_p0 = scmp.lt.u32.totalorder %s3218_s22, %s3797_s0 }
  0x7a   : > { %p3221_p1 = pnand %p3807_p4, %p3219_p9 }
  0x7b   : > { %p3226_p13 = por %p3225_p12, %p3224_p10 }
  0x7c   : > { %p3222_p3 = pneg %p3221_p1 }
  0x7d   : > { %p3228_p5 = por %p3227_p0, %p3226_p13 }
  0x7f   : > { %p3229_p2 = pnand %p3228_p5, %p3222_p3 }
  0x81   : > { %3232 = shalt.err (!%p3229_p2)
}
  0x82   : > { %s3233_s27 = scalar_lea.vmem %s3799_s5, 32  ;;  %s3538_s10 = smov [#allocation5]  }
  0x83   : > { %p3234_p9 = scmp.ne.s32.totalorder %s3799_s5, %s3233_s27  ;;  %s3238_s20 = sshll.u32 %s3538_s10, 4  ;;  %s3239_s20 = int_to_ptr.vmem [resolvable:$false] %s3238_s20 }
  0x84   : > { %s3240_s1 = scalar_lea.vmem %s3239_s20, 64  ;;  %p3241_p6 = scmp.lt.s32.totalorder %s3799_s5, %s3239_s20 }
  0x85   : > { %p3236_p1 = pnand %p3234_p9, %p3807_p4  ;;  %p3242_p8 = scmp.lt.s32.totalorder %s3240_s1, %s3233_s27 }
  0x87   : > { %p3237_p11 = pneg %p3236_p1  ;;  %p3243_p10 = por %p3242_p8, %p3241_p6 }
  0x89   : > { %p3244_p12 = pnand %p3243_p10, %p3237_p11 }
  0x8b   : > { %3247 = shalt.err (!%p3244_p12)
}
  0x8c   : > { %3034 = dma.hbm_to_vmem [thread:$0]  (!%p3783_p7), %s3797_s0, 32, %s3799_s5, %s3801_s19  }
  0x8d   : > { %s4575_s22 = sshll.u32 %s3534_s21, 5  ;;  %s4576_s4 = sld [smem:[#allocation37_spill]] }
  0x8e   : > { %s3539_s17 = smov [#allocation10]   ;;  %s3540_s27 = smov [#allocation13]  }
  0x8f   : > { %s541_s20 = sshll.u32 %s3539_s17, 4  ;;  %s574_s1 = sshll.u32 %s3540_s27, 4  ;;  %s542_s20 = int_to_ptr.vmem [resolvable:$true] %s541_s20  ;;  %s3838_s1 = int_to_ptr.vmem [resolvable:$true] %s574_s1 }
  0x90   : > { %s4577_s6 = sld [smem:[#allocation39_spill]]  ;;  %p4578_p8 = scmp.ne.s32.totalorder %s4561_s18, 0 }
  0x93   : > { %s3836_s10 = scalar_lea.hbm %s4576_s4, %s4575_s22 }
  0x96   : > { %s3248_s13 = scalar_lea.hbm %s4577_s6, 128 }
  0x97   : > { %p3249_p6 = scmp.ne.s32.totalorder %s4577_s6, %s3248_s13  ;;  %p3255_p5 = scmp.lt.u32.totalorder %s3248_s13, %s4577_s6 }
  0x99   : > { %p3251_p11 = pnand %p3249_p6, %p4578_p8 }
  0x9b   : > { %p3252_p2 = pneg %p3251_p11 }
  0x9d   : > { %p3257_p3 = pnand %p3255_p5, %p3252_p2 }
  0x9f   : > { %3260 = shalt.err (!%p3257_p3)
}
  0xa0   : > { %s3261_s17 = scalar_lea.vmem %s542_s20, 128  ;;  %p3269_p1 = scmp.lt.s32.totalorder %s542_s20, %s542_s20 }
  0xa1   : > { %p3262_p13 = scmp.ne.s32.totalorder %s542_s20, %s3261_s17  ;;  %p3270_p10 = scmp.lt.s32.totalorder %s3261_s17, %s3261_s17 }
  0xa3   : > { %p3264_p0 = pnand %p3262_p13, %p4578_p8  ;;  %p3271_p12 = por %p3270_p10, %p3269_p1 }
  0xa5   : > { %p3265_p9 = pneg %p3264_p0 }
  0xa7   : > { %p3272_p7 = pnand %p3271_p12, %p3265_p9 }
  0xa9   : > { %3275 = shalt.err (!%p3272_p7)
}
  0xaa   : > { %p4579_p6 = scmp.ne.s32.totalorder %s4559_s3, 0  ;;  %s3276_s15 = scalar_lea.hbm %s4494_s12, 1024 }
  0xab   : > { %p3277_p11 = scmp.ne.s32.totalorder %s4494_s12, %s3276_s15  ;;  %p3283_p7 = scmp.lt.u32.totalorder %s3276_s15, %s4494_s12 }
  0xac   : > { %3021 = dma.hbm_to_vmem [thread:$0]  (!%p4579_p6), %s4577_s6, 128, %s542_s20, [#allocation9]  }
  0xad   : > { %p3279_p2 = pnand %p3277_p11, %p4578_p8 }
  0xaf   : > { %p3280_p5 = pneg %p3279_p2 }
  0xb1   : > { %p3285_p3 = pnand %p3283_p7, %p3280_p5 }
  0xb3   : > { %3288 = shalt.err (!%p3285_p3)
}
  0xb4   : > { %s3289_s20 = scalar_lea.vmem %s3838_s1, 1024  ;;  %p3297_p1 = scmp.lt.s32.totalorder %s3838_s1, %s3838_s1 }
  0xb5   : > { %p3290_p13 = scmp.ne.s32.totalorder %s3838_s1, %s3289_s20  ;;  %p3298_p10 = scmp.lt.s32.totalorder %s3289_s20, %s3289_s20 }
  0xb7   : > { %p3292_p0 = pnand %p3290_p13, %p4578_p8  ;;  %p3299_p12 = por %p3298_p10, %p3297_p1 }
  0xb9   : > { %p3293_p9 = pneg %p3292_p0 }
  0xbb   : > { %p3300_p11 = pnand %p3299_p12, %p3293_p9 }
  0xbd   : > { %3303 = shalt.err (!%p3300_p11)
}
  0xbe   : > { %s3541_s5 = smov 128   ;;  %s3542_s0 = smov 8  }
  0xbf   : > { %3027 = dma.hbm_to_vmem [thread:$0]  (!%p4579_p6), %s4494_s12, 1024, %s3838_s1, [#allocation12], %s3541_s5, %s3541_s5, %s3542_s0  }
  0xc0   : > { %s2599_s8 = sshll.u32 %s3773_s25, 4  ;;  %s2656_s11 = sshll.u32 %s3534_s21, 8 }
  0xc1   : > { %s4580_s15 = sld [smem:[#allocation34_spill]]  ;;  %s609_s29 = scalar_lea.vmem [#allocation2], %s2599_s8 }
  0xc2   : > { %s616_s3 = sshll.u32 %s609_s29, 4  ;;  %s4581_s24 = sshll.u32 %s3773_s25, 1  ;;  %s3891_s3 = int_to_ptr.vmem [resolvable:$true] %s616_s3 }
  0xc3   : > { %s3895_s27 = scalar_lea.vmem [#allocation7], %s4581_s24  ;;  %s606_s20 = scalar_lea.sflag [#allocation3], %s3773_s25 }
  0xc4   : > { %s663_s1 = sshll.u32 %s3895_s27, 4  ;;  %s664_s1 = int_to_ptr.vmem [resolvable:$true] %s663_s1 }
  0xc7   : > { %s3889_s22 = scalar_lea.hbm %s4580_s15, %s2656_s11  ;;  %s3309_s13 = scalar_lea.hbm %s4580_s15, 512 }
  0xc8   : > { %s3304_s18 = scalar_lea.hbm %s3889_s22, 256  ;;  %p3310_p5 = scmp.lt.u32.totalorder %s3889_s22, %s4580_s15 }
  0xc9   : > { %p3305_p8 = scmp.ne.s32.totalorder %s3889_s22, %s3304_s18  ;;  %p3311_p7 = scmp.lt.u32.totalorder %s3309_s13, %s3304_s18 }
  0xca   : > { %p3313_p13 = scmp.lt.u32.totalorder %s3304_s18, %s3889_s22 }
  0xcb   : > { %p3307_p6 = pnand %p3305_p8, %p3807_p4  ;;  %p3312_p3 = por %p3311_p7, %p3310_p5 }
  0xcd   : > { %p3308_p2 = pneg %p3307_p6  ;;  %p3314_p0 = por %p3313_p13, %p3312_p3 }
  0xcf   : > { %p3315_p9 = pnand %p3314_p0, %p3308_p2 }
  0xd1   : > { %3318 = shalt.err (!%p3315_p9)
}
  0xd2   : > { %s3319_s29 = scalar_lea.vmem %s3891_s3, 256  ;;  %s3543_s24 = smov [#allocation2]  }
  0xd3   : > { %p3320_p1 = scmp.ne.s32.totalorder %s3891_s3, %s3319_s29  ;;  %s3324_s17 = sshll.u32 %s3543_s24, 4  ;;  %s3325_s17 = int_to_ptr.vmem [resolvable:$false] %s3324_s17 }
  0xd4   : > { %s3326_s11 = scalar_lea.vmem %s3325_s17, 512  ;;  %p3327_p11 = scmp.lt.s32.totalorder %s3891_s3, %s3325_s17 }
  0xd5   : > { %p3322_p10 = pnand %p3320_p1, %p3807_p4  ;;  %p3328_p8 = scmp.lt.s32.totalorder %s3326_s11, %s3319_s29 }
  0xd7   : > { %p3323_p12 = pneg %p3322_p10  ;;  %p3329_p6 = por %p3328_p8, %p3327_p11 }
  0xd9   : > { %p3330_p5 = pnand %p3329_p6, %p3323_p12 }
  0xdb   : > { %3333 = shalt.err (!%p3330_p5)
}
  0xdc   : > { %p4582_p2 = scmp.ne.s32.totalorder %s4571_s16, 0  ;;  %s3334_s18 = scalar_lea.hbm %s3836_s10, 32 }
  0xdd   : > { %p3335_p7 = scmp.ne.s32.totalorder %s3836_s10, %s3334_s18  ;;  %s3339_s25 = scalar_lea.hbm %s4576_s4, 64 }
  0xde   : > { %3031 = dma.hbm_to_vmem [thread:$0]  (!%p4582_p2), %s3889_s22, 256, %s3891_s3, %s606_s20, %s3541_s5, %s3541_s5, %s3542_s0  }
  0xdf   : > { %p3337_p3 = pnand %p3335_p7, %p3807_p4  ;;  %p3340_p0 = scmp.lt.u32.totalorder %s3836_s10, %s4576_s4 }
  0xe0   : > { %p3341_p9 = scmp.lt.u32.totalorder %s3339_s25, %s3334_s18  ;;  %p3343_p10 = scmp.lt.u32.totalorder %s3334_s18, %s3836_s10 }
  0xe1   : > { %p3338_p13 = pneg %p3337_p3 }
  0xe2   : > { %p3342_p1 = por %p3341_p9, %p3340_p0 }
  0xe4   : > { %p3344_p12 = por %p3343_p10, %p3342_p1 }
  0xe6   : > { %p3345_p11 = pnand %p3344_p12, %p3338_p13 }
  0xe8   : > { %3348 = shalt.err (!%p3345_p11)
}
  0xe9   : > { %s3349_s5 = scalar_lea.vmem %s664_s1, 32  ;;  %s3544_s0 = smov [#allocation7]  }
  0xea   : > { %p3350_p8 = scmp.ne.s32.totalorder %s664_s1, %s3349_s5  ;;  %s3354_s22 = sshll.u32 %s3544_s0, 4  ;;  %s3355_s22 = int_to_ptr.vmem [resolvable:$false] %s3354_s22 }
  0xeb   : > { %s3356_s3 = scalar_lea.vmem %s3355_s22, 64  ;;  %p3357_p7 = scmp.lt.s32.totalorder %s664_s1, %s3355_s22 }
  0xec   : > { %p3352_p6 = pnand %p3350_p8, %p3807_p4  ;;  %p3358_p3 = scmp.lt.s32.totalorder %s3356_s3, %s3349_s5 }
  0xee   : > { %p3353_p5 = pneg %p3352_p6  ;;  %p3359_p2 = por %p3358_p3, %p3357_p7 }
  0xf0   : > { %p3360_p0 = pnand %p3359_p2, %p3353_p5 }
  0xf2   : > { %3363 = shalt.err (!%p3360_p0)
}
  0xf3   : > { %p4583_p9 = scmp.ne.s32.totalorder %s4571_s16, 0  ;;  %p4584_p13 = scmp.ne.s32.totalorder %s4558_s23, 0 }
  0xf4   : > { %s3948_s28 = sand.u32 (!%p4584_p13), 1, %s3526_s30   ;;  %p4585_p4 = scmp.ne.s32.totalorder (!%p4584_p13), %s4566_s26, 0 }
  0xf5   : > { %3037 = dma.hbm_to_vmem [thread:$0]  (!%p4583_p9), %s3836_s10, 32, %s664_s1, %s3801_s19  }
  0xf6   : > { %672 = sbr.rel (%p4584_p13) target bundleno = 3754 (0xeaa), region = 84  ;;  %s2607_s27 = sshll.u32 (!%p4584_p13), %s3948_s28, 4 }
  0xf7   : > { %s675_s20 = scalar_lea.sflag (!%p4584_p13), [#allocation3], %s3948_s28  ;;  %s678_s24 = scalar_lea.vmem (!%p4584_p13), [#allocation2], %s2607_s27 }
  0xfd   : > { %3493 = dma.done.wait (%p4585_p4), %s675_s20, 256  }
  0xfe   : > { %3495 = vsyncadd (%p4585_p4), %s675_s20, 4294967040  ;;  %s4532_s23 = sand.u32 1, %s3679_s2   ;;  %s3958_s19 = sshll.u32 %s3948_s28, 1 }
  0xff   : > { %s684_s16 = scalar_lea.sflag [#allocation6], %s4532_s23  ;;  %s687_s10 = scalar_lea.vmem [#allocation5], %s3958_s19 }
 0x100   : > { %3497 = dma.done.wait (%p4585_p4), %s684_s16, 64  }
 0x101   : > { %3499 = vsyncadd (%p4585_p4), %s684_s16, 4294967232  ;;  %s696_s1 = scalar_lea.vmem [#allocation7], %s3958_s19  ;;  %p4586_p2 = scmp.eq.s32.totalorder %s3679_s2, 0 }
 0x103   : > { %3501 = dma.done.wait (%p4586_p2), [#allocation9], 256   ;;  %p4587_p1 = pmov %p4586_p2 }
 0x105   : > { %3503 = vsyncadd (%p4587_p1), [#allocation9], 4294967040  ;;  %p4588_p10 = pmov %p4587_p1 }
 0x106   : > { %p4589_p12 = pmov %p4587_p1 }
 0x107   : > { %3505 = dma.done.wait (%p4588_p10), [#allocation12], 1040  }
 0x108   : > { %3507 = vsyncadd (%p4589_p12), [#allocation12], 4294966256  ;;  %p800_p11 = scmp.lt.s32.totalorder %s3679_s2, 1  ;;  %v3545_v0 = vmov 0.0   ;;  %vm3546_vm0 = vmmov 0   ;;  %s4590_s13 = sld [smem:[#allocation33_spill]] }
 0x109   : > { %2734 = vmatprep.subr.bf16.mxu0 %v3545_v0  ;;  %2736 = vmatprep.mubr.msk.bf16.mxu0 %vm3546_vm0, %v3545_v0  ;;  %v3989_v3 = vld [vmem:[%s678_s24] sm:$0xff]  ;;  %vm817_vm1 = vcmask 130048   ;;  %v3991_v5 = vld [vmem:[%s678_s24 + $0x8] sm:$0xff]  ;;  %vm880_vm2 = vcmask 64512   ;;  %v3547_v23 = vmov 0   ;;  %s4591_s7 = sld [smem:[#allocation40_spill]] }
 0x10a   : > { %s3981_s26 = scalar_select %p800_p11, %s3679_s2, 1  ;;  %v818_v6 = vsel %vm817_vm1, %v3989_v3, 0.0  ;;  %v3997_v7 = vpack.c.bf16 %v3991_v5, %v3989_v3  ;;  %v821_v8 = vsel %vm817_vm1, %v3991_v5, 0.0  ;;  %v879_v9 = vld [vmem:[#allocation10] sm:$0xff]  ;;  %v878_v10 = vld [vmem:[#allocation8] sm:$0xff]  ;;  %3109 = vset.pattern.permute.xlu1 %v3547_v23  ;;  %3108 = vset.pattern.permute.xlu0 %v3547_v23  ;;  %vm1054_vm3 = vcmask 261120  }
 0x10b   : > { %819 = vadd.xlane.f32.xlu0 %v818_v6  ;;  %2740 = vmatprep.subr.mxu1 %v879_v9  ;;  %s3548_s29 = smov 96   ;;  %s4592_s22 = sld [smem:[#allocation35_spill]]  ;;  %vm1171_vm4 = vcmask 523264   ;;  %vm1624_vm5 = vcmask 15360   ;;  %vm1704_vm6 = vcmask 1041408   ;;  %vm1697_vm7 = vcmask 539648  }
 0x10c   : > { %s2657_s17 = sshll.u32 %s3981_s26, 4  ;;  %2741 = vmatpush3.msra.mxu1 %v879_v9  ;;  %s4593_s9 = sld [smem:[#allocation42_spill]]  ;;  %vm2107_vm8 = vcmask 9216  }
 0x10d   : > { %2745 = vmatprep.subr.mxu1 %v878_v10  ;;  %s4594_s24 = sld [smem:[#allocation41_spill]]  ;;  %s4595_s26 = sld [smem:[#allocation44_spill]] }
 0x10e   : > { %s804_s14 = scalar_lea.vmem %s4590_s13, %s2657_s17  ;;  %s4596_s18 = sld [smem:[#allocation45_spill]] }
 0x10f   : > { %v811_v1 = vld [vmem:[%s804_s14] sm:$0xff]  ;;  %v812_v2 = vld [vmem:[%s804_s14 + $0x8] sm:$0xff]  ;;  %822 = vadd.xlane.f32.xlu0 %v821_v8  ;;  %s3549_s13 = smov 32   ;;  %s4597_s8 = sld [smem:[#allocation46_spill]] }
 0x110   : > { %v831_v4 = vpack.c.bf16 %v812_v2, %v811_v1  ;;  %2742 = vmatprep.mubr.msk.f32.mxu1 %vm880_vm2, %v811_v1  ;;  %v2625_v24 = vld [vmem:[%s4591_s7] ss:$0 sm:$0xff]  ;;  %s4598_s16 = sld [smem:[#allocation47_spill]]  ;;  %s780_s11 = scalar_lea.vmem [#allocation14], %s3958_s19 }
 0x111   : > { %2743 = vmatmul.mubr.msk.f32.vlgmr.msra.gmra.mrb[0].mxu1 %vm880_vm2, %v812_v2  ;;  %s809_s3 = scalar_lea.vmem %s4592_s22, %s2657_s17  ;;  %s3551_s17 = smov 126  }
 0x112   : > { %2735 = vmatpush3.bf16.msra.mxu0 %v831_v4  ;;  %2746 = vmatpush3.msra.mxu1 %v878_v10  ;;  %v816_v33 = vld [vmem:[%s809_s3 + $0x8] sm:$0xff]  ;;  %v1163_v38 = vld [vmem:[%s4593_s9] sm:$0xff]  ;;  %v1165_v42 = vld [vmem:[%s4593_s9 + $0x10] sm:$0xff]  ;;  %s2293_s14 = sshll.u32 %s780_s11, 4  ;;  %s4533_s25 = sshll.u32 %s3679_s2, 5  ;;  %s4324_s14 = int_to_ptr.vmem [resolvable:$true] %s2293_s14 }
 0x113   : > { %2750 = vmatprep.subr.bf16.mxu1 %v3545_v0  ;;  %v1164_v39 = vld [vmem:[%s4593_s9 + $0x8] sm:$0xff]  ;;  %v815_v40 = vld [vmem:[%s809_s3] sm:$0xff]  ;;  %v1166_v43 = vld [vmem:[%s4593_s9 + $0x18] sm:$0xff]  ;;  %s3550_s3 = smov 64   ;;  %s4600_s22 = sld [smem:[#allocation48_spill]] }
 0x114   : > { %v2887_v41 = vpack.c.bf16 %v1164_v39, %v1163_v38  ;;  %v2891_v44 = vpack.c.bf16 %v1166_v43, %v1165_v42  ;;  %v1167_v45 = vld [vmem:[%s4593_s9 + $0x20] sm:$0xff]  ;;  %v1168_v46 = vld [vmem:[%s4593_s9 + $0x28] sm:$0xff]  ;;  %v1169_v48 = vld [vmem:[%s4593_s9 + $0x30] sm:$0xff]  ;;  %s2267_s27 = scalar_lea.sflag [#allocation4], %s3948_s28  ;;  %s3364_s20 = scalar_lea.vmem %s4324_s14, 32 }
 0x115   : > { %2737 = vmatmul.mubr.msk.bf16.vlgmr.msra.gmra.mrb[0].mxu0 %vm817_vm1, %v3997_v7  ;;  %v2895_v47 = vpack.c.bf16 %v1168_v46, %v1167_v45  ;;  %v1170_v49 = vld [vmem:[%s4593_s9 + $0x38] sm:$0xff]  ;;  %v1155_v51 = vld [vmem:[%s4594_s24] sm:$0xff]  ;;  %v1156_v52 = vld [vmem:[%s4594_s24 + $0x8] sm:$0xff]  ;;  %p3365_p8 = scmp.ne.s32.totalorder %s4324_s14, %s3364_s20 }
 0x116   : > { %2888 = vmatprep.subr.bf16.mxu0 %v2887_v41  ;;  %v2899_v50 = vpack.c.bf16 %v1170_v49, %v1169_v48  ;;  %v2903_v53 = vpack.c.bf16 %v1156_v52, %v1155_v51  ;;  %v1157_v23 = vld [vmem:[%s4594_s24 + $0x10] sm:$0xff]  ;;  %v2631_v45 = vld [vmem:[#allocation11] ss:$0 sm:$0xff] }
 0x117   : > { %2890 = vmatpush3.bf16.msra.mxu0 %v2887_v41 }
 0x118   : > { %2892 = vmatprep.subr.bf16.mxu0 %v2891_v44 }
 0x11b   : > { %2894 = vmatpush3.bf16.msra.mxu0 %v2891_v44 }
 0x11c   : > { %2896 = vmatprep.subr.bf16.mxu0 %v2895_v47 }
 0x11f   : > { %2898 = vmatpush3.bf16.msra.mxu0 %v2895_v47 }
 0x120   : > { %2900 = vmatprep.subr.bf16.mxu0 %v2899_v50 }
 0x123   : > { %2902 = vmatpush3.bf16.msra.mxu0 %v2899_v50 }
 0x124   : > { %2904 = vmatprep.subr.bf16.mxu0 %v2903_v53 }
 0x198   : > { %v820_v11 = vpop.xlane.xlu0 %819 }
 0x199   : > { %v824_v13 = vmax.f32 %v820_v11, 1.0 }
 0x19b   : > { %3120 = vrcp.f32 %v824_v13 }
 0x19c   : > { %v823_v12 = vpop.xlane.xlu0 %822 }
 0x19d   : > { %v825_v14 = vmax.f32 %v823_v12, 1.0 }
 0x19f   : > { %3122 = vrcp.f32 %v825_v14 }
 0x1a5   : > { %v4006_v15 = vpop.eup %3120 }
 0x1a9   : > { %v4008_v16 = vpop.eup %3122 }
 0x1e8   : > { %v869_v17 = vpop.f32.mrb[0].mxu0 }
 0x1e9   : > { %v876_v18 = vmul.f32 %v4006_v15, %v869_v17  ;;  %v2738_v19 = vpop.f32.mrb[1].mxu0 }
 0x1ea   : > { %v872_v20 = vpop.f32.mrb[2].mxu0 }
 0x1eb   : > { %v877_v21 = vmul.f32 %v4008_v16, %v872_v20  ;;  %v2739_v22 = vpop.f32.mrb[3].mxu0  ;;  %2747 = vmatprep.mubr.msk.f32.mxu1 %vm880_vm2, %v876_v18 }
 0x1ed   : > { %2748 = vmatmul.mubr.msk.f32.vlgmr.msra.gmra.mrb[0].mxu1 %vm880_vm2, %v877_v21 }
 0x1ee   : > { %2752 = vmatprep.mubr.msk.bf16.mxu1 %vm3546_vm0, %v3545_v0 }
 0x2c0   : > { %v2749_v25 = vpop.f32.mrb[0].mxu1 }
 0x2c1   : > { %v1034_v26 = vpop.f32.mrb[1].mxu1  ;;  %v4021_v28 = vadd.f32 %v2749_v25, %v2625_v24 }
 0x2c2   : > { %v4019_v27 = vadd.f32 %v2625_v24, %v1034_v26  ;;  %v1158_v24 = vld [vmem:[%s4594_s24 + $0x18] sm:$0xff] }
 0x2c3   : > { %v1053_v31 = vmul.f32 %v4021_v28, %v4021_v28 }
 0x2c4   : > { %v1052_v29 = vmul.f32 %v4019_v27, %v4019_v27 }
 0x2c5   : > { %v1058_v32 = vsel %vm1054_vm3, %v1053_v31, 0.0 }
 0x2c6   : > { %1069 = vrot.lane.b32.xlu1 %v1052_v29, %s3548_s29  ;;  %v1055_v30 = vsel %vm1054_vm3, %v1052_v29, 0.0 }
 0x2c7   : > { %1056 = vadd.xlane.f32.xlu0 %v1055_v30  ;;  %v2907_v30 = vpack.c.bf16 %v1158_v24, %v1157_v23 }
 0x2ca   : > { %1071 = vrot.lane.b32.xlu1 %v1053_v31, %s3548_s29 }
 0x2ee   : > { %1059 = vadd.xlane.f32.xlu1 %v1058_v32 }
 0x2ff   : > { %1094 = vperm.xlu1 %3109, %v816_v33   ;;  %v1159_v33 = vld [vmem:[%s4594_s24 + $0x20] sm:$0xff] }
 0x338   : > { %v1070_v34 = vpop.permute.xlu1 %1069 }
 0x339   : > { %v1075_v37 = vsel %vm1054_vm3, %v1070_v34, 0.0  ;;  %v1160_v34 = vld [vmem:[%s4594_s24 + $0x28] sm:$0xff] }
 0x33c   : > { %v1072_v35 = vpop.permute.xlu1 %1071 }
 0x33d   : > { %v1078_v36 = vsel %vm1054_vm3, %v1072_v35, 0.0  ;;  %v2911_v35 = vpack.c.bf16 %v1160_v34, %v1159_v33  ;;  %v1443_v33 = vld [vmem:[#allocation13] sm:$0xff]  ;;  %v1444_v34 = vld [vmem:[#allocation13 + $0x8] sm:$0xff] }
 0x33e   : > { %1079 = vadd.xlane.f32.xlu0 %v1078_v36  ;;  %v1161_v36 = vld [vmem:[%s4594_s24 + $0x30] sm:$0xff] }
 0x342   : > { %1076 = vadd.xlane.f32.xlu0 %v1075_v37  ;;  %v1162_v37 = vld [vmem:[%s4594_s24 + $0x38] sm:$0xff] }
 0x343   : > { %v2915_v38 = vpack.c.bf16 %v1162_v37, %v1161_v36 }
 0x354   : > { %v1057_v55 = vpop.xlane.xlu0 %1056 }
 0x355   : > { %v1061_v57 = vmax.f32 %v1057_v55, 1e-24 }
 0x358   : > { %1089 = vperm.xlu0 %3108, %v815_v40  }
 0x37b   : > { %v1060_v54 = vpop.xlane.xlu1 %1059 }
 0x37c   : > { %v1062_v56 = vmax.f32 %v1060_v54, 1e-24 }
 0x37e   : > { %3124 = vrsqrt.f32 %v1062_v56 }
 0x37f   : > { %3126 = vrsqrt.f32 %v1061_v57  ;;  %v4069_v4 = vpop.permute.xlu1 %1094 }
 0x388   : > { %v3125_v62 = vpop.eup %3124 }
 0x389   : > { %v3127_v63 = vpop.eup %3126  ;;  %v1066_v1 = vmul.f32 %v3125_v62, %v4021_v28 }
 0x38a   : > { %v1065_v9 = vmul.f32 %v3127_v63, %v4019_v27 }
 0x38b   : > { %v1098_v11 = vmul.f32 %v4069_v4, %v1066_v1 }
 0x38d   : > { %v1102_v20 = vmax.f32 %v1098_v11, 0.0 }
 0x38f   : > { %v4090_v26 = vmul.f32 0.999995, %v1102_v20 }
 0x3cb   : > { %v1080_v58 = vpop.xlane.xlu0 %1079 }
 0x3cc   : > { %v1082_v59 = vmax.f32 %v1080_v58, 1e-24 }
 0x3ce   : > { %3128 = vrsqrt.f32 %v1082_v59 }
 0x3cf   : > { %v1077_v60 = vpop.xlane.xlu0 %1076 }
 0x3d0   : > { %v1081_v61 = vmax.f32 %v1077_v60, 1e-24 }
 0x3d2   : > { %3130 = vrsqrt.f32 %v1081_v61 }
 0x3d7   : > { %v4071_v6 = vpop.permute.xlu0 %1089 }
 0x3d8   : > { %v3129_v2 = vpop.eup %3128  ;;  %v1097_v10 = vmul.f32 %v4071_v6, %v1065_v9 }
 0x3d9   : > { %v1086_v8 = vmul.f32 %v3129_v2, %v4021_v28 }
 0x3da   : > { %v1101_v19 = vmax.f32 %v1097_v10, 0.0 }
 0x3db   : > { %v1100_v12 = vmul.f32 %v4069_v4, %v1086_v8 }
 0x3dc   : > { %v3131_v13 = vpop.eup %3130  ;;  %v4088_v25 = vmul.f32 0.999995, %v1101_v19 }
 0x3dd   : > { %v1085_v14 = vmul.f32 %v3131_v13, %v4019_v27  ;;  %v1106_v17 = vmax.f32 %v1100_v12, 0.0 }
 0x3df   : > { %v1099_v18 = vmul.f32 %v4071_v6, %v1085_v14  ;;  %v4080_v22 = vmul.f32 0.999995, %v1106_v17 }
 0x3e1   : > { %v1105_v21 = vmax.f32 %v1099_v18, 0.0  ;;  %v1110_v29 = vsel %vm1054_vm3, %v4090_v26, %v4080_v22 }
 0x3e3   : > { %v4092_v27 = vmul.f32 0.999995, %v1105_v21 }
 0x3e5   : > { %v1109_v28 = vsel %vm1054_vm3, %v4088_v25, %v4092_v27  ;;  %v3110_v31 = vpack.i.bf16 %v4080_v22, %v4092_v27 }
 0x3e6   : > { %v1111_v32 = vpack.c.bf16 %v1110_v29, %v1109_v28  ;;  %2772 = vmatprep.mubr.msk.f32.mxu0 %vm1171_vm4, %v1109_v28 }
 0x3e7   : > { %2773 = vmatmul.mubr.msk.f32.vlgmr.msra.gmra.mrb[4].mxu0 %vm1171_vm4, %v1110_v29 }
 0x3e8   : > { %2751 = vmatpush3.bf16.msra.mxu1 %v1111_v32  ;;  %2906 = vmatpush3.bf16.msra.mxu0 %v2903_v53 }
 0x3e9   : > { %2908 = vmatprep.subr.bf16.mxu0 %v2907_v30  ;;  %2794 = vmatprep.subr.bf16.mxu1 %v3545_v0 }
 0x3eb   : > { %2753 = vmatmul.mubr.msk.bf16.vlgmr.msra.gmra.mrb[4].mxu1 %vm817_vm1, %v3997_v7 }
 0x3ec   : > { %2910 = vmatpush3.bf16.msra.mxu0 %v2907_v30  ;;  %2796 = vmatprep.mubr.msk.bf16.mxu1 %vm3546_vm0, %v3545_v0 }
 0x3ed   : > { %2912 = vmatprep.subr.bf16.mxu0 %v2911_v35 }
 0x3f0   : > { %2914 = vmatpush3.bf16.msra.mxu0 %v2911_v35 }
 0x3f1   : > { %2916 = vmatprep.subr.bf16.mxu0 %v2915_v38 }
 0x3f4   : > { %2918 = vmatpush3.bf16.msra.mxu0 %v2915_v38 }
 0x4be   : > { %v1146_v39 = vpop.f32.mrb[4].mxu1 }
 0x4bf   : > { %v1153_v40 = vmul.f32 %v4006_v15, %v1146_v39  ;;  %v2754_v41 = vpop.f32.mrb[5].mxu1  ;;  %v2919_v39 = vpack.c.bf16 %v1444_v34, %v1443_v33  ;;  %v1687_v34 = vld [vmem:[%s4597_s8 + $0x30] sm:$0xff] }
 0x4c0   : > { %v1149_v42 = vpop.f32.mrb[6].mxu1  ;;  %v1445_v41 = vld [vmem:[#allocation13 + $0x10] sm:$0xff] }
 0x4c1   : > { %v1154_v43 = vmul.f32 %v4008_v16, %v1149_v42  ;;  %v2755_v44 = vpop.f32.mrb[7].mxu1  ;;  %2791 = vmatprep.mubr.msk.f32.mxu0 %vm1171_vm4, %v1153_v40  ;;  %v1446_v42 = vld [vmem:[#allocation13 + $0x18] sm:$0xff] }
 0x4c2   : > { %v1447_v44 = vld [vmem:[#allocation13 + $0x20] sm:$0xff] }
 0x4c3   : > { %2792 = vmatmul.mubr.msk.f32.vlgmr.msra.gmra.mrb[4].mxu0 %vm1171_vm4, %v1154_v43  ;;  %v2923_v43 = vpack.c.bf16 %v1446_v42, %v1445_v41  ;;  %v1689_v42 = vld [vmem:[%s4597_s8 + $0x40] sm:$0x3] }
 0x596   : > { %v2793_v46 = vpop.f32.mrb[4].mxu0 }
 0x597   : > { %v1342_v47 = vadd.f32 %v2793_v46, %v2631_v45  ;;  %v1325_v48 = vpop.f32.mrb[5].mxu0 }
 0x598   : > { %v1341_v49 = vadd.f32 %v2631_v45, %v1325_v48  ;;  %v1448_v45 = vld [vmem:[#allocation13 + $0x28] sm:$0xff]  ;;  %v1450_v48 = vld [vmem:[#allocation13 + $0x38] sm:$0xff] }
 0x599   : > { %v1344_v50 = vmul.f32 %v1342_v47, %v1342_v47  ;;  %v2927_v46 = vpack.c.bf16 %v1448_v45, %v1447_v44 }
 0x59a   : > { %v1343_v51 = vmul.f32 %v1341_v49, %v1341_v49 }
 0x59b   : > { %1361 = vrot.lane.b32.xlu0 %v1344_v50, %s3548_s29  ;;  %v1348_v52 = vsel %vm1054_vm3, %v1344_v50, 0.0  ;;  %v1435_v50 = vld [vmem:[%s4595_s26] sm:$0xff] }
 0x59c   : > { %1359 = vrot.lane.b32.xlu1 %v1343_v51, %s3548_s29  ;;  %v1345_v53 = vsel %vm1054_vm3, %v1343_v51, 0.0  ;;  %v1436_v51 = vld [vmem:[%s4595_s26 + $0x8] sm:$0xff] }
 0x5ba   : > { %1349 = vadd.xlane.f32.xlu0 %v1348_v52  ;;  %v2935_v52 = vpack.c.bf16 %v1436_v51, %v1435_v50 }
 0x5c0   : > { %1346 = vadd.xlane.f32.xlu1 %v1345_v53  ;;  %v1437_v53 = vld [vmem:[%s4595_s26 + $0x10] sm:$0xff] }
 0x60d   : > { %v1362_v54 = vpop.permute.xlu0 %1361 }
 0x60e   : > { %v1360_v55 = vpop.permute.xlu1 %1359  ;;  %v1368_v56 = vsel %vm1054_vm3, %v1362_v54, 0.0  ;;  %v1438_v54 = vld [vmem:[%s4595_s26 + $0x18] sm:$0xff] }
 0x60f   : > { %1369 = vadd.xlane.f32.xlu1 %v1368_v56  ;;  %v1365_v57 = vsel %vm1054_vm3, %v1360_v55, 0.0  ;;  %v2939_v55 = vpack.c.bf16 %v1438_v54, %v1437_v53  ;;  %v1439_v56 = vld [vmem:[%s4595_s26 + $0x20] sm:$0xff] }
 0x610   : > { %1366 = vadd.xlane.f32.xlu0 %v1365_v57  ;;  %v1440_v57 = vld [vmem:[%s4595_s26 + $0x28] sm:$0xff] }
 0x647   : > { %v1350_v58 = vpop.xlane.xlu0 %1349 }
 0x648   : > { %v1352_v60 = vmax.f32 %v1350_v58, 1e-24  ;;  %v2943_v58 = vpack.c.bf16 %v1440_v57, %v1439_v56  ;;  %v2638_v57 = vld [vmem:[%s4598_s16] ss:$0 sm:$0xff]  ;;  %s3554_s16 = smov [#allocation14]  }
 0x64a   : > { %3132 = vrsqrt.f32 %v1352_v60  ;;  %v1442_v60 = vld [vmem:[%s4595_s26 + $0x38] sm:$0xff] }
 0x64d   : > { %v1347_v59 = vpop.xlane.xlu1 %1346 }
 0x64e   : > { %v1351_v61 = vmax.f32 %v1347_v59, 1e-24  ;;  %v1441_v59 = vld [vmem:[%s4595_s26 + $0x30] sm:$0xff] }
 0x650   : > { %3134 = vrsqrt.f32 %v1351_v61  ;;  %v2947_v61 = vpack.c.bf16 %v1442_v60, %v1441_v59 }
 0x654   : > { %v3133_v8 = vpop.eup %3132 }
 0x655   : > { %v1356_v10 = vmul.f32 %v3133_v8, %v1342_v47 }
 0x657   : > { %v1378_v12 = vmul.f32 %v1356_v10, %v4069_v4  ;;  %v2637_v10 = vld [vmem:[%s4596_s18] ss:$0 sm:$0xff]  ;;  %s4534_s18 = scalar_lea.vmem [#allocation17], %s3948_s28 }
 0x659   : > { %v1382_v21 = vmax.f32 %v1378_v12, 0.0 }
 0x65a   : > { %v3135_v9 = vpop.eup %3134 }
 0x65b   : > { %v1355_v11 = vmul.f32 %v3135_v9, %v1341_v49  ;;  %v4135_v30 = vmul.f32 0.999995, %v1382_v21  ;;  %v1683_v21 = vld [vmem:[%s4597_s8 + $0x10] sm:$0xff] }
 0x65d   : > { %v1377_v14 = vmul.f32 %v1355_v11, %v4071_v6 }
 0x65f   : > { %v1381_v24 = vmax.f32 %v1377_v14, 0.0 }
 0x661   : > { %v4139_v35 = vmul.f32 0.999995, %v1381_v24  ;;  %v1684_v24 = vld [vmem:[%s4597_s8 + $0x18] sm:$0xff] }
 0x69c   : > { %v1370_v62 = vpop.xlane.xlu1 %1369 }
 0x69d   : > { %v1372_v63 = vmax.f32 %v1370_v62, 1e-24  ;;  %v1367_v1 = vpop.xlane.xlu0 %1366 }
 0x69e   : > { %v1371_v2 = vmax.f32 %v1367_v1, 1e-24 }
 0x69f   : > { %3136 = vrsqrt.f32 %v1372_v63 }
 0x6a0   : > { %3138 = vrsqrt.f32 %v1371_v2 }
 0x6a9   : > { %v3137_v13 = vpop.eup %3136 }
 0x6aa   : > { %v3139_v17 = vpop.eup %3138  ;;  %v1376_v18 = vmul.f32 %v3137_v13, %v1342_v47  ;;  %v1449_v47 = vld [vmem:[#allocation13 + $0x30] sm:$0xff] }
 0x6ab   : > { %v1375_v19 = vmul.f32 %v3139_v17, %v1341_v49  ;;  %v2931_v49 = vpack.c.bf16 %v1450_v48, %v1449_v47 }
 0x6ac   : > { %v1380_v20 = vmul.f32 %v1376_v18, %v4069_v4 }
 0x6ad   : > { %v1379_v23 = vmul.f32 %v1375_v19, %v4071_v6  ;;  %v1681_v19 = vld [vmem:[%s4597_s8] sm:$0xff] }
 0x6ae   : > { %v1386_v28 = vmax.f32 %v1380_v20, 0.0  ;;  %v1682_v20 = vld [vmem:[%s4597_s8 + $0x8] sm:$0xff] }
 0x6af   : > { %v1385_v29 = vmax.f32 %v1379_v23, 0.0  ;;  %v2951_v23 = vpack.c.bf16 %v1682_v20, %v1681_v19 }
 0x6b0   : > { %v4137_v32 = vmul.f32 0.999995, %v1386_v28  ;;  %v2955_v28 = vpack.c.bf16 %v1684_v24, %v1683_v21 }
 0x6b1   : > { %v4141_v36 = vmul.f32 0.999995, %v1385_v29  ;;  %v1685_v29 = vld [vmem:[%s4597_s8 + $0x20] sm:$0xff]  ;;  %2952 = vmatprep.subr.bf16.mxu0 %v2951_v23 }
 0x6b2   : > { %v1390_v37 = vsel %vm1054_vm3, %v4135_v30, %v4137_v32  ;;  %2954 = vmatpush3.bf16.msra.mxu0 %v2951_v23 }
 0x6b3   : > { %v1389_v38 = vsel %vm1054_vm3, %v4139_v35, %v4141_v36  ;;  %2956 = vmatprep.subr.bf16.mxu0 %v2955_v28 }
 0x6b4   : > { %v1391_v40 = vpack.c.bf16 %v1390_v37, %v1389_v38 }
 0x6b6   : > { %2795 = vmatpush3.bf16.msra.mxu1 %v1391_v40  ;;  %2958 = vmatpush3.bf16.msra.mxu0 %v2955_v28 }
 0x6b7   : > { %2920 = vmatprep.subr.bf16.mxu1 %v2919_v39 }
 0x6b9   : > { %2797 = vmatmul.mubr.msk.bf16.vlgmr.msra.gmra.mrb[8].mxu1 %vm817_vm1, %v3997_v7 }
 0x6ba   : > { %2922 = vmatpush3.bf16.msra.mxu1 %v2919_v39  ;;  %2816 = vmatprep.mubr.msk.f32.mxu1 %vm1171_vm4, %v1389_v38 }
 0x6bb   : > { %2924 = vmatprep.subr.bf16.mxu1 %v2923_v43 }
 0x6be   : > { %2926 = vmatpush3.bf16.msra.mxu1 %v2923_v43 }
 0x6bf   : > { %2928 = vmatprep.subr.bf16.mxu1 %v2927_v46 }
 0x6c2   : > { %2930 = vmatpush3.bf16.msra.mxu1 %v2927_v46 }
 0x6c3   : > { %2932 = vmatprep.subr.bf16.mxu1 %v2931_v49 }
 0x6c6   : > { %2934 = vmatpush3.bf16.msra.mxu1 %v2931_v49 }
 0x6c7   : > { %2936 = vmatprep.subr.bf16.mxu1 %v2935_v52 }
 0x6c9   : > { %2817 = vmatmul.mubr.msk.f32.vlgmr.msra.gmra.mrb[2].mxu1 %vm1171_vm4, %v1390_v37 }
 0x6ca   : > { %2938 = vmatpush3.bf16.msra.mxu1 %v2935_v52 }
 0x6cb   : > { %2940 = vmatprep.subr.bf16.mxu1 %v2939_v55 }
 0x6ce   : > { %2942 = vmatpush3.bf16.msra.mxu1 %v2939_v55 }
 0x6cf   : > { %2944 = vmatprep.subr.bf16.mxu1 %v2943_v58 }
 0x6d2   : > { %2946 = vmatpush3.bf16.msra.mxu1 %v2943_v58 }
 0x6d3   : > { %2948 = vmatprep.subr.bf16.mxu1 %v2947_v61 }
 0x6d6   : > { %2950 = vmatpush3.bf16.msra.mxu1 %v2947_v61 }
 0x78c   : > { %v1426_v62 = vpop.f32.mrb[8].mxu1 }
 0x78d   : > { %v1433_v63 = vmul.f32 %v4006_v15, %v1426_v62  ;;  %v2798_v1 = vpop.f32.mrb[9].mxu1 }
 0x78e   : > { %v1429_v2 = vpop.f32.mrb[10].mxu1 }
 0x78f   : > { %v1434_v8 = vmul.f32 %v4008_v16, %v1429_v2  ;;  %2835 = vmatprep.mubr.msk.f32.mxu1 %vm1171_vm4, %v1433_v63  ;;  %v2799_v9 = vpop.f32.mrb[11].mxu1 }
 0x791   : > { %2836 = vmatmul.mubr.msk.f32.vlgmr.msra.gmra.mrb[2].mxu1 %vm1171_vm4, %v1434_v8 }
 0x792   : > { %2863 = vmatprep.mubr.msk.f32.mxu1 %vm3546_vm0, %v3545_v0 }
 0x864   : > { %v2837_v11 = vpop.f32.mrb[2].mxu1 }
 0x865   : > { %v4186_v12 = vadd.f32 %v2837_v11, %v2637_v10  ;;  %v1604_v15 = vpop.f32.mrb[3].mxu1 }
 0x866   : > { %v4188_v13 = vadd.f32 %v2637_v10, %v1604_v15 }
 0x867   : > { %v4192_v16 = vmul.f32 %v4186_v12, %v4186_v12 }
 0x868   : > { %v4196_v14 = vmul.f32 %v4188_v13, %v4188_v13 }
 0x869   : > { %v1628_v17 = vsel %vm1624_vm5, %v4192_v16, 0.0 }
 0x86a   : > { %1629 = vadd.xlane.f32.xlu1 %v1628_v17  ;;  %v1625_v18 = vsel %vm1624_vm5, %v4196_v14, 0.0 }
 0x86b   : > { %1626 = vadd.xlane.f32.xlu0 %v1625_v18  ;;  %v3552_v18 = vmov 0.0|0.0  }
 0x86c   : > { %2967 = vmatprep.subr.bf16.mxu1 %v3552_v18 }
 0x87b   : > { %1665 = vrot.lane.b32.xlu1 %v4135_v30, %s3549_s13  ;;  %v1686_v30 = vld [vmem:[%s4597_s8 + $0x28] sm:$0xff] }
 0x87c   : > { %v2959_v33 = vpack.c.bf16 %v1686_v30, %v1685_v29 }
 0x87e   : > { %2960 = vmatprep.subr.bf16.mxu0 %v2959_v33 }
 0x87f   : > { %2962 = vmatpush3.bf16.msra.mxu0 %v2959_v33 }
 0x881   : > { %1663 = vrot.lane.b32.xlu0 %v4139_v35, %s3549_s13  ;;  %v1688_v35 = vld [vmem:[%s4597_s8 + $0x38] sm:$0xff]  ;;  %s4599_s13 = sld [smem:[#allocation31_spill]] }
 0x882   : > { %v2963_v37 = vpack.c.bf16 %v1688_v35, %v1687_v34 }
 0x884   : > { %2964 = vmatprep.subr.bf16.mxu0 %v2963_v37 }
 0x885   : > { %2966 = vmatpush3.bf16.msra.mxu0 %v2963_v37 }
 0x886   : > { %2854 = vmatprep.subr.msk.mxu0 %vm1704_vm6, %v1689_v42 }
 0x887   : > { %p4601_p6 = scmp.ne.s32.totalorder %s4599_s13, 0 }
 0x889   : > { %2855 = vmatpush3.msk.msra.mxu0 %vm1704_vm6, %v1689_v42  ;;  %p3366_p5 = pnand %p3365_p8, %p4601_p6 }
 0x88a   : > { %2970 = vmatprep.subr.bf16.mxu0 %v3552_v18 }
 0x88b   : > { %p3367_p7 = pneg %p3366_p5 }
 0x8f7   : > { %v1630_v38 = vpop.xlane.xlu1 %1629 }
 0x8f8   : > { %v1632_v39 = vmax.f32 %v1630_v38, 1e-24  ;;  %v1627_v40 = vpop.xlane.xlu0 %1626 }
 0x8f9   : > { %v1631_v41 = vmax.f32 %v1627_v40, 1e-24 }
 0x8fa   : > { %3140 = vrsqrt.f32 %v1632_v39 }
 0x8fb   : > { %3142 = vrsqrt.f32 %v1631_v41  ;;  %v1666_v50 = vpop.permute.xlu1 %1665 }
 0x8fc   : > { %v1664_v49 = vpop.permute.xlu0 %1663  ;;  %v1678_v54 = vsel %vm1054_vm3, %v4090_v26, %v1666_v50 }
 0x8fd   : > { %v1677_v52 = vsel %vm1054_vm3, %v4088_v25, %v1664_v49 }
 0x904   : > { %v3141_v43 = vpop.eup %3140 }
 0x905   : > { %v3143_v44 = vpop.eup %3142  ;;  %v1636_v45 = vmul.f32 %v3141_v43, %v4186_v12 }
 0x906   : > { %v1635_v46 = vmul.f32 %v3143_v44, %v4188_v13 }
 0x907   : > { %v1658_v47 = vmul.f32 %v1636_v45, %v4069_v4 }
 0x908   : > { %v1657_v48 = vmul.f32 %v1635_v46, %v4071_v6 }
 0x909   : > { %1673 = vrot.lane.b32.xlu0 %v1658_v47, %s3550_s3 }
 0x90a   : > { %1671 = vrot.lane.b32.xlu1 %v1657_v48, %s3550_s3  ;;  %s2291_s3 = scalar_lea.hbm %s4600_s22, %s4533_s25 }
 0x97b   : > { %v1674_v51 = vpop.permute.xlu0 %1673 }
 0x97c   : > { %v1672_v53 = vpop.permute.xlu1 %1671  ;;  %v1680_v56 = vsel %vm1171_vm4, %v1678_v54, %v1674_v51 }
 0x97d   : > { %v1679_v55 = vsel %vm1171_vm4, %v1677_v52, %v1672_v53 }
 0x97e   : > { %2856 = vmatprep.mubr.msk.f32.mxu0 %vm1697_vm7, %v1679_v55 }
 0x97f   : > { %2857 = vmatmul.mubr.msk.f32.vlgmr.msra.gmra.mrb[6].mxu0 %vm1697_vm7, %v1680_v56 }
 0x980   : > { %2870 = vmatprep.mubr.msk.f32.mxu0 %vm3546_vm0, %v3545_v0  ;;  %2972 = vmatpush3.bf16.msra.mxu0 %v3997_v7 }
 0x981   : > { %2976 = vmatprep.subr.bf16.mxu0 %v3552_v18 }
 0xa52   : > { %v2858_v58 = vpop.f32.mrb[6].mxu0 }
 0xa53   : > { %v1780_v59 = vadd.f32 %v2858_v58, %v2638_v57  ;;  %v1774_v25 = vpop.f32.mrb[7].mxu0 }
 0xa54   : > { %v1775_v60 = vadd.f32 %v2638_v57, %v1774_v25  ;;  %v2084_v25 = vlaneseq }
 0xa55   : > { %v1786_v61 = vsel %vm1624_vm5, %v1780_v59, -inf }
 0xa56   : > { %1787 = vmax.xlane.f32.xlu0 %v1786_v61  ;;  %v1783_v26 = vsel %vm1624_vm5, %v1775_v60, -inf }
 0xa57   : > { %1784 = vmax.xlane.f32.xlu1 %v1783_v26 }
 0xae3   : > { %v1788_v62 = vpop.xlane.xlu0 %1787 }
 0xae4   : > { %v1790_v63 = vsub.f32 %v1780_v59, %v1788_v62  ;;  %v1785_v1 = vpop.xlane.xlu1 %1784 }
 0xae5   : > { %v1789_v2 = vsub.f32 %v1775_v60, %v1785_v1 }
 0xae6   : > { %v1793_v8 = vmul.f32 1.442695, %v1790_v63  ;;  %v2091_v63 = vmul.f32 %v3989_v3, %v3989_v3 }
 0xae7   : > { %v1791_v9 = vmul.f32 1.442695, %v1789_v2  ;;  %v2085_v2 = vshrl.u32 %v2084_v25, 7 }
 0xae8   : > { %3144 = vpow2.f32 %v1793_v8  ;;  %v2087_v8 = vand.u32 127, %v2084_v25 }
 0xae9   : > { %3146 = vpow2.f32 %v1791_v9 }
 0xaea   : > { %vm2088_vm9 = vcmp.eq.s32.totalorder %v2085_v2, %v2087_v8 }
 0xaf2   : > { %v3145_v10 = vpop.eup %3144 }
 0xaf3   : > { %v3147_v11 = vpop.eup %3146  ;;  %v1798_v15 = vsel %vm1624_vm5, %v3145_v10, 0.0 }
 0xaf4   : > { %1799 = vadd.xlane.f32.xlu1 %v1798_v15  ;;  %v1795_v17 = vsel %vm1624_vm5, %v3147_v11, 0.0 }
 0xaf5   : > { %1796 = vadd.xlane.f32.xlu0 %v1795_v17 }
 0xb05   : > { %1639 = vrot.lane.b32.xlu1 %v4196_v14, %s3551_s17 }
 0xb09   : > { %1641 = vrot.lane.b32.xlu1 %v4192_v16, %s3551_s17  ;;  %s3368_s17 = sshll.u32 %s3554_s16, 4  ;;  %s3369_s17 = int_to_ptr.vmem [resolvable:$false] %s3368_s17 }
 0xb0a   : > { %p3371_p3 = scmp.lt.s32.totalorder %s4324_s14, %s3369_s17 }
 0xb81   : > { %v1800_v19 = vpop.xlane.xlu1 %1799 }
 0xb82   : > { %3148 = vrcp.f32 %v1800_v19  ;;  %v1797_v20 = vpop.xlane.xlu0 %1796  ;;  %v2093_v19 = vsel %vm817_vm1, %v2091_v63, 0.0 }
 0xb83   : > { %3150 = vrcp.f32 %v1797_v20  ;;  %v2092_v20 = vmul.f32 %v3991_v5, %v3991_v5 }
 0xb85   : > { %v1640_v21 = vpop.permute.xlu1 %1639 }
 0xb86   : > { %v1645_v23 = vsel %vm1171_vm4, %v1640_v21, 0.0 }
 0xb87   : > { %1646 = vadd.xlane.f32.xlu1 %v1645_v23 }
 0xb89   : > { %v1642_v33 = vpop.permute.xlu1 %1641 }
 0xb8a   : > { %v1648_v34 = vsel %vm1171_vm4, %v1642_v33, 0.0 }
 0xb8c   : > { %v3149_v24 = vpop.eup %3148 }
 0xb8d   : > { %v3151_v28 = vpop.eup %3150  ;;  %v1804_v29 = vmul.f32 %v3149_v24, %v3145_v10  ;;  %v4309_v24 = vsel %vm2088_vm9, 1.0, %v3545_v0 }
 0xb8e   : > { %v1802_v14 = vmul.f32 %v3151_v28, %v3147_v11  ;;  %v2096_v28 = vsel %vm817_vm1, %v2092_v20, 0.0 }
 0xb8f   : > { %v4257_v16 = vmul.f32 %v1804_v29, %v4069_v4 }
 0xb90   : > { %v4260_v30 = vmul.f32 %v1802_v14, %v4071_v6 }
 0xb91   : > { %v2206_v54 = vadd.f32 1e-15, %v4257_v16  ;;  %v2204_v1 = vsub.f32 0.0, %v4257_v16 }
 0xb92   : > { %1827 = vxpose.xlu0.b32.start [1/2] (short) (narrow) %v4260_v30, 8  ;;  %v2974_v7 = vpack.c.bf16 %v4257_v16, %v4260_v30  ;;  %v2205_v61 = vadd.f32 1e-15, %v4260_v30  ;;  %v2203_v33 = vsub.f32 0.0, %v4260_v30 }
 0xb96   : > { %1828 = vxpose.xlu0.b32.end [2/2] (short) (narrow) %v4257_v16, 8 }
 0xb98   : > { %3111 = vrot.lane.b32.xlu1 %v3110_v31, %s3548_s29  ;;  %s3553_s29 = smov 62  }
 0xbc3   : > { %1649 = vadd.xlane.f32.xlu0 %v1648_v34 }
 0xc12   : > { %v1843_v35 = vpop.trf.xlu0 }
 0xc13   : > { %2871 = vmatmul.mubr.msk.f32.vlgmr.msra.gmra.mrb[8].mxu0 %vm817_vm1, %v1843_v35 }
 0xc14   : > { %2978 = vmatpush3.bf16.msra.mxu0 %v2974_v7  ;;  %2884 = vmatprep.mubr.msk.f32.mxu0 %vm3546_vm0, %v3545_v0  ;;  %v1647_v37 = vpop.xlane.xlu1 %1646 }
 0xc15   : > { %v1651_v38 = vmax.f32 %v1647_v37, 1e-24 }
 0xc17   : > { %2885 = vmatmul.mubr.msk.f32.vlgmr.msra.gmra.mrb[10].mxu0 %vm817_vm1, %v1843_v35  ;;  %3152 = vrsqrt.f32 %v1651_v38 }
 0xc18   : > { %v3112_v45 = vpop.permute.xlu1 %3111 }
 0xc19   : > { %v3114_v46 = vunpack.i.h.bf16 %v3112_v45  ;;  %v3113_v47 = vunpack.i.l.bf16 %v3112_v45 }
 0xc1b   : > { %v1824_v51 = vsel %vm1054_vm3, %v3114_v46, %v4137_v32 }
 0xc21   : > { %v3153_v22 = vpop.eup %3152 }
 0xc22   : > { %v1655_v27 = vmul.f32 %v3153_v22, %v4188_v13  ;;  %v1823_v13 = vsel %vm1054_vm3, %v3113_v47, %v4141_v36 }
 0xc24   : > { %v1659_v42 = vmul.f32 %v1655_v27, %v4071_v6 }
 0xc50   : > { %v1650_v39 = vpop.xlane.xlu0 %1649 }
 0xc51   : > { %v1652_v40 = vmax.f32 %v1650_v39, 1e-24 }
 0xc53   : > { %3154 = vrsqrt.f32 %v1652_v40 }
 0xc54   : > { %3156 = vlog2.f32 %v2206_v54 }
 0xc55   : > { %3158 = vlog2.f32 %v2205_v61 }
 0xc5d   : > { %v3155_v31 = vpop.eup %3154 }
 0xc5e   : > { %v1656_v41 = vmul.f32 %v3155_v31, %v4186_v12  ;;  %v3157_v58 = vpop.eup %3156 }
 0xc5f   : > { %v2210_v26 = vmul.f32 0.6931472, %v3157_v58  ;;  %v3159_v5 = vpop.eup %3158 }
 0xc60   : > { %v1660_v43 = vmul.f32 %v1656_v41, %v4069_v4 }
 0xc62   : > { %v3115_v44 = vpack.i.bf16 %v1660_v43, %v1659_v42 }
 0xc64   : > { %3116 = vrot.lane.b32.xlu1 %v3115_v44, %s3553_s29  ;;  %s3370_s29 = scalar_lea.vmem %s3369_s17, 64 }
 0xc65   : > { %p3372_p0 = scmp.lt.s32.totalorder %s3370_s29, %s3364_s20 }
 0xc67   : > { %p3373_p9 = por %p3372_p0, %p3371_p3 }
 0xc69   : > { %p3374_p13 = pnand %p3373_p9, %p3367_p7 }
 0xcd6   : > { %v3117_v48 = vpop.permute.xlu1 %3116 }
 0xcd7   : > { %v3119_v49 = vunpack.i.h.bf16 %v3117_v48  ;;  %v3118_v50 = vunpack.i.l.bf16 %v3117_v48 }
 0xcd9   : > { %v1825_v12 = vsel %vm1171_vm4, %v1823_v13, %v3118_v50  ;;  %v1826_v4 = vsel %vm1171_vm4, %v1824_v51, %v3119_v49 }
 0xcda   : > { %v2968_v6 = vpack.c.bf16 %v1826_v4, %v1825_v12 }
 0xcdc   : > { %2969 = vmatpush3.bf16.msra.mxu1 %v2968_v6 }
 0xcdd   : > { %2973 = vmatprep.subr.bf16.mxu1 %v3552_v18  ;;  %v2212_v18 = vmul.f32 %v2210_v26, %v2204_v1 }
 0xcdf   : > { %2864 = vmatmul.mubr.msk.f32.vlgmr.msra.gmra.mrb[12].mxu1 %vm817_vm1, %v1843_v35  ;;  %v2216_v23 = vsel %vm1624_vm5, %v2212_v18, 0.0 }
 0xce0   : > { %2975 = vmatpush3.bf16.msra.mxu1 %v2974_v7  ;;  %2877 = vmatprep.mubr.msk.f32.mxu1 %vm3546_vm0, %v3545_v0  ;;  %v2208_v7 = vmul.f32 0.6931472, %v3159_v5 }
 0xce2   : > { %v2211_v35 = vmul.f32 %v2208_v7, %v2203_v33 }
 0xce4   : > { %v2213_v37 = vsel %vm1624_vm5, %v2211_v35, 0.0 }
 0xce6   : > { %v2007_v52 = vpop.f32.mrb[8].mxu0 }
 0xce7   : > { %2878 = vmatmul.mubr.msk.f32.vlgmr.msra.gmra.mrb[14].mxu1 %vm817_vm1, %v2007_v52  ;;  %v2872_v32 = vpop.f32.mrb[9].mxu0 }
 0xcea   : > { %v2184_v36 = vpop.f32.mrb[10].mxu0 }
 0xceb   : > { %v2886_v53 = vpop.f32.mrb[11].mxu0  ;;  %v2188_v14 = vmul.f32 %v2184_v36, %v2184_v36 }
 0xced   : > { %v2189_v34 = vsel %vm2107_vm8, %v2188_v14, 0.0 }
 0xdb2   : > { %v1928_v55 = vpop.f32.mrb[12].mxu1 }
 0xdb3   : > { %1932 = vst [vmem:[%s780_s11] sm:$0x3] %v1928_v55  ;;  %v1933_v56 = vsel %vm1704_vm6, %v1928_v55, -inf  ;;  %v2865_v57 = vpop.f32.mrb[13].mxu1 }
 0xdb4   : > { %v1934_v59 = vrot.slane %v1933_v56, 4 }
 0xdb6   : > { %v1935_v60 = vmax.f32 %v1933_v56, %v1934_v59 }
 0xdb8   : > { %v1936_v62 = vrot.slane %v1935_v60, 2 }
 0xdba   : > { %v1937_v9 = vmax.f32 %v1935_v60, %v1936_v62  ;;  %v4298_v10 = vpop.f32.mrb[14].mxu1 }
 0xdbb   : > { %v2240_v11 = vsel %vm2107_vm8, %v4298_v10, -inf  ;;  %v2230_v15 = vsel %vm2107_vm8, %v4298_v10, inf  ;;  %v2879_v17 = vpop.f32.mrb[15].mxu1  ;;  %v2106_v29 = vmul.f32 %v4309_v24, %v4298_v10 }
 0xdbc   : > { %v1938_v3 = vrot.slane %v1937_v9, 1  ;;  %2241 = vmax.xlane.f32.xlu0 %v2240_v11  ;;  %2231 = vmin.xlane.f32.xlu1 %v2230_v15 }
 0xdbd   : > { %v2108_v16 = vsel %vm2107_vm8, %v2106_v29, 0.0 }
 0xdbe   : > { %v1939_v21 = vmax.f32 %v1937_v9, %v1938_v3 }
 0xdc0   : > { %2094 = vadd.xlane.f32.xlu0 %v2093_v19  ;;  %2217 = vadd.xlane.f32.xlu1 %v2216_v23  ;;  %1940 = vst [vmem:[%s4534_s18] sm:$0x1] %v1939_v21 }
 0xdc4   : > { %2097 = vadd.xlane.f32.xlu0 %v2096_v28 }
 0xdc8   : > { %2109 = vadd.xlane.f32.xlu0 %v2108_v16 }
 0xdcc   : > { %2190 = vadd.xlane.f32.xlu0 %v2189_v34 }
 0xdd0   : > { %2214 = vadd.xlane.f32.xlu0 %v2213_v37 }
 0xdd1   : > { %3377 = shalt.err (!%p3374_p13)
}
 0xdd2   : > { %s3378_s11 = scalar_lea.hbm %s2291_s3, 32  ;;  %s3382_s23 = scalar_lea.hbm %s4600_s22, 64 }
 0xdd3   : > { %p3379_p4 = scmp.ne.s32.totalorder %s2291_s3, %s3378_s11  ;;  %p3383_p10 = scmp.lt.u32.totalorder %s2291_s3, %s4600_s22 }
 0xdd4   : > { %p3384_p12 = scmp.lt.u32.totalorder %s3382_s23, %s3378_s11  ;;  %p3386_p8 = scmp.lt.u32.totalorder %s3378_s11, %s2291_s3 }
 0xdd5   : > { %p3380_p2 = pnand %p3379_p4, %p4601_p6 }
 0xdd6   : > { %p3385_p11 = por %p3384_p12, %p3383_p10 }
 0xdd7   : > { %p3381_p1 = pneg %p3380_p2 }
 0xdd8   : > { %p3387_p5 = por %p3386_p8, %p3385_p11 }
 0xdda   : > { %p3388_p7 = pnand %p3387_p5, %p3381_p1 }
 0xddc   : > { %3391 = shalt.err (!%p3388_p7)
}
 0xddd   : > { %3007 = dma.vmem_to_hbm [thread:$0]  (%p4601_p6), %s4324_s14, 32, %s2291_s3, %s2267_s27   ;;  %v2255_v16 = vld [vmem:[%s687_s10] sm:$0x3]  ;;  %v2258_v7 = vld [vmem:[%s696_s1] sm:$0x3]  ;;  %vm2226_vm10 = vcmask 7168  }
 0xdde   : > { %s2652_s23 = sshll.u32 %s3679_s2, 4  ;;  %s799_s18 = scalar_lea.vmem [#allocation18], %s3948_s28  ;;  %vm2228_vm11 = vcmask 8192   ;;  %vm2263_vm12 = vcmp.gt.f32.partialorder %v4309_v24, 0.0 }
 0xddf   : > { %s2332_s14 = sshll.u32 %s799_s18, 4  ;;  %s4535_s25 = scalar_lea.vmem [#allocation15], %s3958_s19  ;;  %s4370_s14 = int_to_ptr.vmem [resolvable:$true] %s2332_s14 }
 0xde0   : > { %s2306_s3 = sshll.u32 %s4535_s25, 4  ;;  %s4602_s27 = scalar_lea.vmem [#allocation17], %s3948_s28  ;;  %s4379_s3 = int_to_ptr.vmem [resolvable:$true] %s2306_s3 }
 0xde1   : > { %s2319_s10 = sshll.u32 %s4602_s27, 4  ;;  %s4603_s16 = sld [smem:[#allocation51_spill]]  ;;  %s4387_s10 = int_to_ptr.vmem [resolvable:$true] %s2319_s10 }
 0xde2   : > { %s4604_s29 = sshll.u32 %s3679_s2, 5  ;;  %s4605_s0 = sld [smem:[#allocation49_spill]] }
 0xde3   : > { %s4607_s20 = sld [smem:[#allocation50_spill]]  ;;  %s2281_s8 = scalar_lea.sflag [#allocation19], %s3948_s28 }
 0xde4   : > { %s3392_s9 = scalar_lea.vmem %s4370_s14, 16 }
 0xde5   : > { %p3393_p3 = scmp.ne.s32.totalorder %s4370_s14, %s3392_s9 }
 0xde7   : > { %s4368_s17 = scalar_lea.hbm %s4603_s16, %s2652_s23  ;;  %p3394_p0 = pnand %p3393_p3, %p4601_p6 }
 0xde8   : > { %s4606_s25 = smov %s4605_s0  ;;  %s4377_s4 = scalar_lea.hbm %s4605_s0, %s4604_s29 }
 0xde9   : > { %s4608_s6 = smov %s4607_s20  ;;  %s4385_s7 = scalar_lea.hbm %s4607_s20, %s2652_s23 }
 0xdea   : > { %p3395_p9 = pneg %p3394_p0  ;;  %s3555_s29 = smov [#allocation18]  }
 0xdeb   : > { %s3396_s11 = sshll.u32 %s3555_s29, 4  ;;  %s3397_s11 = int_to_ptr.vmem [resolvable:$false] %s3396_s11 }
 0xdec   : > { %s3398_s5 = scalar_lea.vmem %s3397_s11, 32  ;;  %p3399_p13 = scmp.lt.s32.totalorder %s4370_s14, %s3397_s11 }
 0xded   : > { %p3400_p4 = scmp.lt.s32.totalorder %s3398_s5, %s3392_s9 }
 0xdef   : > { %p3401_p2 = por %p3400_p4, %p3399_p13 }
 0xdf1   : > { %p3402_p1 = pnand %p3401_p2, %p3395_p9 }
 0xe49   : > { %v2242_v30 = vpop.xlane.xlu0 %2241  ;;  %v2232_v38 = vpop.xlane.xlu1 %2231 }
 0xe4a   : > { %v2243_v39 = vsel %vm1704_vm6, %v2242_v30, -inf  ;;  %v2233_v40 = vsel %vm1704_vm6, %v2232_v38, inf }
 0xe4b   : > { %v2244_v22 = vrot.slane %v2243_v39, 4  ;;  %v2234_v27 = vrot.slane %v2233_v40, 4 }
 0xe4d   : > { %v2245_v31 = vmax.f32 %v2243_v39, %v2244_v22  ;;  %v2235_v41 = vmin.f32 %v2233_v40, %v2234_v27  ;;  %v2095_v42 = vpop.xlane.xlu0 %2094  ;;  %v2218_v60 = vpop.xlane.xlu1 %2217 }
 0xe4f   : > { %v2246_v43 = vrot.slane %v2245_v31, 2  ;;  %v2236_v44 = vrot.slane %v2235_v41, 2 }
 0xe51   : > { %v2247_v45 = vmax.f32 %v2245_v31, %v2246_v43  ;;  %v2237_v46 = vmin.f32 %v2235_v41, %v2236_v44  ;;  %v2098_v47 = vpop.xlane.xlu0 %2097 }
 0xe52   : > { %v2099_v48 = vadd.f32 %v2098_v47, %v2095_v42 }
 0xe53   : > { %v2248_v49 = vrot.slane %v2247_v45, 1  ;;  %v2238_v50 = vrot.slane %v2237_v46, 1 }
 0xe54   : > { %v2100_v51 = vrot.slane %v2099_v48, 4 }
 0xe55   : > { %v2249_v13 = vmax.f32 %v2247_v45, %v2248_v49  ;;  %v2239_v12 = vmin.f32 %v2237_v46, %v2238_v50  ;;  %v2110_v4 = vpop.xlane.xlu0 %2109 }
 0xe56   : > { %v2101_v6 = vadd.f32 %v2100_v51, %v2099_v48  ;;  %v2111_v52 = vsel %vm1704_vm6, %v2110_v4, 0.0 }
 0xe57   : > { %v2251_v32 = vsub.f32 %v2249_v13, %v2239_v12  ;;  %v2112_v36 = vrot.slane %v2111_v52, 4  ;;  %v2250_v20 = vsub.f32 %v4298_v10, %v2239_v12 }
 0xe58   : > { %v2102_v53 = vrot.slane %v2101_v6, 2 }
 0xe59   : > { %v2252_v54 = vmax.f32 %v2251_v32, 1e-12  ;;  %v2113_v55 = vadd.f32 %v2112_v36, %v2111_v52  ;;  %v2191_v56 = vpop.xlane.xlu0 %2190 }
 0xe5a   : > { %v2192_v57 = vsel %vm1704_vm6, %v2191_v56, 0.0  ;;  %v2103_v58 = vadd.f32 %v2102_v53, %v2101_v6 }
 0xe5b   : > { %3160 = vrcp.f32 %v2252_v54  ;;  %v2114_v59 = vrot.slane %v2113_v55, 2  ;;  %v2193_v25 = vrot.slane %v2192_v57, 4 }
 0xe5c   : > { %v2104_v1 = vrot.slane %v2103_v58, 1 }
 0xe5d   : > { %v2115_v61 = vadd.f32 %v2114_v59, %v2113_v55  ;;  %v2194_v26 = vadd.f32 %v2193_v25, %v2192_v57  ;;  %v2215_v62 = vpop.xlane.xlu0 %2214 }
 0xe5e   : > { %v2219_v63 = vadd.f32 %v2218_v60, %v2215_v62  ;;  %v2105_v18 = vadd.f32 %v2104_v1, %v2103_v58 }
 0xe5f   : > { %v2116_v2 = vrot.slane %v2115_v61, 1  ;;  %v2195_v8 = vrot.slane %v2194_v26, 2 }
 0xe60   : > { %v2220_v9 = vrot.slane %v2219_v63, 4 }
 0xe61   : > { %v2117_v11 = vadd.f32 %v2116_v2, %v2115_v61  ;;  %v2196_v15 = vadd.f32 %v2195_v8, %v2194_v26 }
 0xe62   : > { %v2221_v17 = vadd.f32 %v2220_v9, %v2219_v63 }
 0xe63   : > { %v2199_v3 = vmul.f32 2.0, %v2117_v11  ;;  %v2197_v19 = vrot.slane %v2196_v15, 1 }
 0xe64   : > { %v2222_v21 = vrot.slane %v2221_v17, 2 }
 0xe65   : > { %v3161_v23 = vpop.eup %3160  ;;  %v2200_v28 = vsub.f32 %v2105_v18, %v2199_v3  ;;  %v2198_v29 = vadd.f32 %v2197_v19, %v2196_v15 }
 0xe66   : > { %v2254_v5 = vmul.f32 %v3161_v23, %v2250_v20  ;;  %v2223_v14 = vadd.f32 %v2222_v21, %v2221_v17 }
 0xe67   : > { %v2201_v33 = vadd.f32 %v2200_v28, %v2198_v29 }
 0xe68   : > { %v2257_v34 = vsub.f32 1.0, %v2254_v5  ;;  %v2224_v35 = vrot.slane %v2223_v14, 1  ;;  %v2256_v37 = vadd.f32 %v2255_v16, %v2254_v5 }
 0xe69   : > { %v2202_v10 = vmax.f32 %v2201_v33, 0.0 }
 0xe6a   : > { %v2259_v30 = vadd.f32 %v2258_v7, %v2257_v34  ;;  %v2225_v38 = vadd.f32 %v2224_v35, %v2223_v14 }
 0xe6c   : > { %vm2260_vm13 = vcmp.gt.f32.partialorder %v2256_v37, %v2259_v30  ;;  %v2227_v24 = vsel %vm2226_vm10, %v2202_v10, %v2225_v38 }
 0xe6d   : > { %v2647_v39 = vsel %vm2260_vm13, 1.0, %v3545_v0  ;;  %2229 = vst.msk [vmem:[%s799_s18] sm:$0x1] %vm2228_vm11, %v2227_v24 }
 0xe6e   : > { %v2264_v40 = vsel %vm2263_vm12, 1.0, %v2647_v39 }
 0xe6f   : > { %3405 = shalt.err (!%p3402_p1)
}
 0xe70   : > { %s3406_s28 = scalar_lea.hbm %s4368_s17, 16  ;;  %s3410_s0 = scalar_lea.hbm %s4603_s16, 32 }
 0xe71   : > { %p3407_p10 = scmp.ne.s32.totalorder %s4368_s17, %s3406_s28  ;;  %p3411_p8 = scmp.lt.u32.totalorder %s4368_s17, %s4603_s16 }
 0xe72   : > { %p3412_p5 = scmp.lt.u32.totalorder %s3410_s0, %s3406_s28  ;;  %p3414_p3 = scmp.lt.u32.totalorder %s3406_s28, %s4368_s17 }
 0xe73   : > { %p3408_p12 = pnand %p3407_p10, %p4601_p6 }
 0xe74   : > { %p3413_p7 = por %p3412_p5, %p3411_p8 }
 0xe75   : > { %p3409_p11 = pneg %p3408_p12 }
 0xe76   : > { %p3415_p0 = por %p3414_p3, %p3413_p7 }
 0xe78   : > { %p3416_p9 = pnand %p3415_p0, %p3409_p11 }
 0xe7a   : > { %3419 = shalt.err (!%p3416_p9)
}
 0xe7b   : > { %3010 = dma.vmem_to_hbm [thread:$0]  (%p4601_p6), %s4370_s14, 16, %s4368_s17, %s2281_s8  }
 0xe7c   : > { %s4609_s9 = scalar_lea.vmem [#allocation15], %s3958_s19  ;;  %s4610_s20 = sand.u32 1, %s3679_s2  }
 0xe7d   : > { %2265 = vst.msk [vmem:[%s4609_s9] sm:$0x3] %vm2107_vm8, %v2264_v40  ;;  %s4416_s29 = scalar_lea.sflag [#allocation16], %s4610_s20  ;;  %s3420_s11 = scalar_lea.vmem %s4379_s3, 32 }
 0xe7e   : > { %p3421_p13 = scmp.ne.s32.totalorder %s4379_s3, %s3420_s11  ;;  %s3556_s5 = smov [#allocation15]  }
 0xe7f   : > { %s3424_s28 = sshll.u32 %s3556_s5, 4  ;;  %s3425_s28 = int_to_ptr.vmem [resolvable:$false] %s3424_s28 }
 0xe80   : > { %p3422_p4 = pnand %p3421_p13, %p4601_p6  ;;  %s3426_s23 = scalar_lea.vmem %s3425_s28, 64 }
 0xe81   : > { %p3427_p1 = scmp.lt.s32.totalorder %s4379_s3, %s3425_s28  ;;  %p3428_p10 = scmp.lt.s32.totalorder %s3426_s23, %s3420_s11 }
 0xe82   : > { %p3423_p2 = pneg %p3422_p4 }
 0xe83   : > { %p3429_p12 = por %p3428_p10, %p3427_p1 }
 0xe85   : > { %p3430_p11 = pnand %p3429_p12, %p3423_p2 }
 0xe87   : > { %3433 = shalt.err (!%p3430_p11)
}
 0xe88   : > { %s3434_s2 = scalar_lea.hbm %s4377_s4, 32  ;;  %s3438_s14 = scalar_lea.hbm %s4606_s25, 64 }
 0xe89   : > { %p3435_p8 = scmp.ne.s32.totalorder %s4377_s4, %s3434_s2  ;;  %p3439_p3 = scmp.lt.u32.totalorder %s4377_s4, %s4606_s25 }
 0xe8a   : > { %p3440_p0 = scmp.lt.u32.totalorder %s3438_s14, %s3434_s2  ;;  %p3442_p13 = scmp.lt.u32.totalorder %s3434_s2, %s4377_s4 }
 0xe8b   : > { %p3436_p5 = pnand %p3435_p8, %p4601_p6 }
 0xe8c   : > { %p3441_p9 = por %p3440_p0, %p3439_p3 }
 0xe8d   : > { %p3437_p7 = pneg %p3436_p5 }
 0xe8e   : > { %p3443_p4 = por %p3442_p13, %p3441_p9 }
 0xe90   : > { %p3444_p2 = pnand %p3443_p4, %p3437_p7 }
 0xe92   : > { %3447 = shalt.err (!%p3444_p2)
}
 0xe93   : > { %3008 = dma.vmem_to_hbm [thread:$0]  (%p4601_p6), %s4379_s3, 32, %s4377_s4, %s4416_s29  }
 0xe94   : > { %s3448_s0 = scalar_lea.vmem %s4387_s10, 16  ;;  %s3557_s27 = smov [#allocation17]  }
 0xe95   : > { %p3449_p1 = scmp.ne.s32.totalorder %s4387_s10, %s3448_s0  ;;  %s3452_s1 = sshll.u32 %s3557_s27, 4  ;;  %s3453_s1 = int_to_ptr.vmem [resolvable:$false] %s3452_s1 }
 0xe96   : > { %s3454_s9 = scalar_lea.vmem %s3453_s1, 32  ;;  %p3455_p11 = scmp.lt.s32.totalorder %s4387_s10, %s3453_s1 }
 0xe97   : > { %p3450_p10 = pnand %p3449_p1, %p4601_p6  ;;  %p3456_p8 = scmp.lt.s32.totalorder %s3454_s9, %s3448_s0 }
 0xe99   : > { %p3451_p12 = pneg %p3450_p10  ;;  %p3457_p5 = por %p3456_p8, %p3455_p11 }
 0xe9b   : > { %p3458_p7 = pnand %p3457_p5, %p3451_p12 }
 0xe9d   : > { %3461 = shalt.err (!%p3458_p7)
}
 0xe9e   : > { %s3462_s4 = scalar_lea.hbm %s4385_s7, 16  ;;  %s3466_s11 = scalar_lea.hbm %s4608_s6, 32 }
 0xe9f   : > { %p3463_p3 = scmp.ne.s32.totalorder %s4385_s7, %s3462_s4  ;;  %p3467_p13 = scmp.lt.u32.totalorder %s4385_s7, %s4608_s6 }
 0xea0   : > { %p3468_p4 = scmp.lt.u32.totalorder %s3466_s11, %s3462_s4  ;;  %p3470_p1 = scmp.lt.u32.totalorder %s3462_s4, %s4385_s7 }
 0xea1   : > { %p3464_p0 = pnand %p3463_p3, %p4601_p6 }
 0xea2   : > { %p3469_p2 = por %p3468_p4, %p3467_p13 }
 0xea3   : > { %p3465_p9 = pneg %p3464_p0 }
 0xea4   : > { %p3471_p10 = por %p3470_p1, %p3469_p2 }
 0xea6   : > { %p3472_p12 = pnand %p3471_p10, %p3465_p9 }
 0xea8   : > { %3475 = shalt.err (!%p3472_p12)
}
 0xea9   : > { %3009 = dma.vmem_to_hbm [thread:$0]  (%p4601_p6), %s4387_s10, 16, %s4385_s7, %s4416_s29  }
 0xeaa PF: > { %s4611_s23 = sld [smem:[#allocation27_spill]]  ;;  %s4612_s2 = sld [smem:[#allocation32_spill]] }
 0xeab   : > { %p4614_p8 = scmp.ge.s32.totalorder %s3534_s21, 2 }
 0xeb0   : > { %s2344_s19 = sand.u32 1, %s4611_s23   ;;  %p4613_p11 = scmp.ne.s32.totalorder %s4612_s2, 0 }
 0xeb1   : > { %s2345_s8 = scalar_lea.sflag [#allocation4], %s2344_s19 }
 0xeb2   : > { %p3039_p5 = pnand %p4614_p8, %p4613_p11 }
 0xeb4   : > { %3509 = dma.done.wait (!%p3039_p5), %s2345_s8, 32  }
 0xeb5   : > { %3511 = vsyncadd (!%p3039_p5), %s2345_s8, 4294967264  ;;  %s4615_s14 = sadd.s32 4294967294, %s3534_s21  }
 0xeb6   : > { %s2353_s17 = sand.u32 1, %s4615_s14  }
 0xeb7   : > { %s2354_s18 = scalar_lea.sflag [#allocation16], %s2353_s17 }
 0xeb8   : > { %3513 = dma.done.wait (!%p3039_p5), %s2354_s18, 48  }
 0xeb9   : > { %3515 = vsyncadd (!%p3039_p5), %s2354_s18, 4294967248  ;;  %s2371_s13 = scalar_lea.sflag [#allocation19], %s2344_s19 }
 0xeba   : > { %3517 = dma.done.wait (!%p3039_p5), %s2371_s13, 16  }
 0xebb   : > { %3519 = vsyncadd (!%p3039_p5), %s2371_s13, 4294967280  ;;  %s4616_s21 = sld [smem:[#allocation29_spill]]  ;;  %s4617_s7 = sld [smem:[#allocation28_spill]] }
 0xebc   : > { %s4618_s20 = sld [smem:[#allocation30_spill]]  ;;  %s4619_s0 = smov %s3526_s30 }
 0xec1   : > { %p44_p6 = scmp.ge.s32.totalorder %s4616_s21, 4   ;;  %s4620_s30 = smov %s4617_s7 }
 0xec3   :  { %46 = sbr.rel (!%p44_p6) target bundleno = 33 (0x21), region = 224 }
 0xeca   :  { %2375 = vsyncpa [#allocation3], 1 }
 0xecb   :  { %2377 = vsyncpa [#allocation3 + $0x1], 1 }
 0xecc   :  { %2378 = vsyncpa [#allocation6], 1 }
 0xecd   :  { %2380 = vsyncpa [#allocation6 + $0x1], 1 }
 0xece   :  { %2381 = vsyncpa [#allocation9], 1 }
 0xecf   :  { %2382 = vsyncpa [#allocation12], 1 }
 0xed0   :  { %2383 = vsyncpa [#allocation4], 1 }
 0xed1   :  { %2385 = vsyncpa [#allocation4 + $0x1], 1 }
 0xed2   :  { %2386 = vsyncpa [#allocation16], 1 }
 0xed3   :  { %2388 = vsyncpa [#allocation16 + $0x1], 1 }
 0xed4   :  { %2389 = vsyncpa [#allocation19], 1 }
 0xed5   :  { %2391 = vsyncpa [#allocation19 + $0x1], 1 }

</bundles_post_ra>
